<compile_context>
chip_gen: v6e
topology: v6e:2x2x1
jax: 0.10.0
libtpu: 0.0.40
codegen_flags: <defaults>
</compile_context>

<pallas_src>
import functools

import jax
import jax.numpy as jnp
from jax.experimental import pallas as pl
from jax.experimental.pallas import tpu as pltpu


# ---------------------------------------------------------------------------
# helpers
# ---------------------------------------------------------------------------
def _round_up(x, m):
    return ((x + m - 1) // m) * m


def _pad_rows(x, mult=16):
    """Pad leading (M) dim of a 2D array up to a multiple of `mult`."""
    m = x.shape[0]
    mp = _round_up(m, mult)
    if mp != m:
        x = jnp.pad(x, ((0, mp - m), (0, 0)))
    return x, m


# ---------------------------------------------------------------------------
# Pallas kernels
# ---------------------------------------------------------------------------
def _gemm_bias_act_kernel(x_ref, w_ref, b_ref, o_ref, *, relu):
    # x: (TM, K) bf16, w: (K, N) bf16, b: (1, N) f32 -> o: (TM, N)
    acc = jnp.dot(x_ref[...], w_ref[...], preferred_element_type=jnp.float32)
    acc = acc + b_ref[...]
    if relu:
        acc = jnp.maximum(acc, 0.0)
    o_ref[...] = acc.astype(o_ref.dtype)


def _conv3_pool_kernel(p_ref, w_ref, b_ref, o_ref):
    # p: (4, TM, K) bf16 -- 4 pool offsets of conv3 patches for the same output
    # pixel block; w: (K, 64) bf16; b: (1, 64) f32.
    # conv3 has NO ReLU (matches the reference); bias is common to the 4 pool
    # positions so max(dot) + b == max(dot + b).
    w = w_ref[...]
    m = jnp.dot(p_ref[0], w, preferred_element_type=jnp.float32)
    for off in range(1, 4):
        m = jnp.maximum(m, jnp.dot(p_ref[off], w,
                                   preferred_element_type=jnp.float32))
    o_ref[...] = (m + b_ref[...]).astype(o_ref.dtype)


def _mlp_heads_kernel(x_ref, w1_ref, b1_ref, w2_ref, b2_ref, wh_ref, bh_ref,
                      o_ref):
    # flat(B,F) -> Linear512+ReLU -> Linear256+ReLU -> fused heads (N padded
    # to 128). Intermediates stay in VMEM/vregs; only the final (TM,128) f32
    # block is stored (lane-dense).
    h = jnp.dot(x_ref[...], w1_ref[...], preferred_element_type=jnp.float32)
    h = jnp.maximum(h + b1_ref[...], 0.0)
    h = jnp.dot(h.astype(jnp.bfloat16), w2_ref[...],
                preferred_element_type=jnp.float32)
    h = jnp.maximum(h + b2_ref[...], 0.0)
    o = jnp.dot(h.astype(jnp.bfloat16), wh_ref[...],
                preferred_element_type=jnp.float32)
    o_ref[...] = (o + bh_ref[...]).astype(o_ref.dtype)


_PARALLEL = pltpu.CompilerParams(dimension_semantics=("parallel",))


# ---------------------------------------------------------------------------
# Kernel wrappers (M-tiled grids)
# ---------------------------------------------------------------------------
def pallas_gemm_bias(x, w, b, *, relu, tm_cap=512):
    """y = relu?(x @ w + b); x any float (cast to bf16), w bf16, b f32."""
    x, m = _pad_rows(x.astype(jnp.bfloat16))
    mp, k = x.shape
    n = w.shape[1]
    tm = min(tm_cap, mp)
    out = pl.pallas_call(
        functools.partial(_gemm_bias_act_kernel, relu=relu),
        out_shape=jax.ShapeDtypeStruct((mp, n), jnp.bfloat16),
        grid=(pl.cdiv(mp, tm),),
        in_specs=[
            pl.BlockSpec((tm, k), lambda i: (i, 0)),
            pl.BlockSpec((k, n), lambda i: (0, 0)),
            pl.BlockSpec((1, n), lambda i: (0, 0)),
        ],
        out_specs=pl.BlockSpec((tm, n), lambda i: (i, 0)),
        compiler_params=_PARALLEL,
    )(x, w, b.reshape(1, n).astype(jnp.float32))
    return out[:m]


def pallas_conv3_pool(patches, w, b, *, tm_cap=512):
    """Fused conv3 GEMM + 2x2 max-pool. patches: (4, M, K); returns (M, 64)."""
    _, m, k = patches.shape
    mp = _round_up(m, 16)
    if mp != m:
        patches = jnp.pad(patches, ((0, 0), (0, mp - m), (0, 0)))
    n = w.shape[1]
    tm = min(tm_cap, mp)
    out = pl.pallas_call(
        _conv3_pool_kernel,
        out_shape=jax.ShapeDtypeStruct((mp, n), jnp.bfloat16),
        grid=(pl.cdiv(mp, tm),),
        in_specs=[
            pl.BlockSpec((4, tm, k), lambda i: (0, i, 0)),
            pl.BlockSpec((k, n), lambda i: (0, 0)),
            pl.BlockSpec((1, n), lambda i: (0, 0)),
        ],
        out_specs=pl.BlockSpec((tm, n), lambda i: (i, 0)),
        compiler_params=_PARALLEL,
    )(patches, w, b.reshape(1, n).astype(jnp.float32))
    return out[:m]


def pallas_mlp_heads(flat, w1, b1, w2, b2, wh, bh, *, tm_cap=256):
    """Fused flatten->512->ReLU->256->ReLU->heads(padded to 128 cols)."""
    flat, m = _pad_rows(flat.astype(jnp.bfloat16))
    mp, f = flat.shape
    tm = min(tm_cap, mp)
    nh = wh.shape[1]
    out = pl.pallas_call(
        _mlp_heads_kernel,
        out_shape=jax.ShapeDtypeStruct((mp, nh), jnp.float32),
        grid=(pl.cdiv(mp, tm),),
        in_specs=[
            pl.BlockSpec((tm, f), lambda i: (i, 0)),
            pl.BlockSpec((f, 512), lambda i: (0, 0)),
            pl.BlockSpec((1, 512), lambda i: (0, 0)),
            pl.BlockSpec((512, 256), lambda i: (0, 0)),
            pl.BlockSpec((1, 256), lambda i: (0, 0)),
            pl.BlockSpec((256, nh), lambda i: (0, 0)),
            pl.BlockSpec((1, nh), lambda i: (0, 0)),
        ],
        out_specs=pl.BlockSpec((tm, nh), lambda i: (i, 0)),
        compiler_params=_PARALLEL,
    )(flat, w1, b1.reshape(1, -1).astype(jnp.float32),
      w2, b2.reshape(1, -1).astype(jnp.float32),
      wh, bh.reshape(1, -1).astype(jnp.float32))
    return out[:m]


# ---------------------------------------------------------------------------
# Forward pass
# ---------------------------------------------------------------------------
def ddqn_forward(params, x_nchw, n_actions=12):
    x = x_nchw.astype(jnp.bfloat16)
    b, c, h, w = x.shape

    # conv1 (k=4, s=4): non-overlapping patches straight from NCHW with a
    # single reshape/transpose (also absorbs the NCHW->NHWC conversion).
    h1, w1 = (h - 4) // 4 + 1, (w - 4) // 4 + 1
    xc = x[:, :, :h1 * 4, :w1 * 4]
    p1 = jnp.transpose(xc.reshape(b, c, h1, 4, w1, 4), (0, 2, 4, 3, 5, 1))
    p1 = p1.reshape(b * h1 * w1, 4 * 4 * c)                 # (kh, kw, cin) order
    y1 = pallas_gemm_bias(p1, params['w1'], params['b1'], relu=True)

    # conv2 (k=2, s=2): space-to-depth on NHWC activation.
    y1 = y1.reshape(b, h1, w1, 32)
    h2, w2 = h1 // 2, w1 // 2
    p2 = jnp.transpose(
        y1[:, :h2 * 2, :w2 * 2, :].reshape(b, h2, 2, w2, 2, 32),
        (0, 1, 3, 2, 4, 5)).reshape(b * h2 * w2, 2 * 2 * 32)
    y2 = pallas_gemm_bias(p2, params['w2'], params['b2'], relu=True)

    # conv3 (k=2, s=1, no ReLU) fused with MaxPool2d(2): build one patch matrix
    # per 2x2 pool offset; the kernel does 4 GEMMs and the max in its epilogue.
    y2 = y2.reshape(b, h2, w2, 64)
    h3, w3 = h2 - 1, w2 - 1
    hp, wp = h3 // 2, w3 // 2
    offs = []
    for dr in range(2):
        for dc in range(2):
            cols = []
            for kh in range(2):
                for kw in range(2):
                    r0, c0 = dr + kh, dc + kw
                    cols.append(y2[:, r0:r0 + 2 * hp:2, c0:c0 + 2 * wp:2, :])
            offs.append(jnp.stack(cols, axis=3).reshape(b * hp * wp, 4 * 64))
    p3 = jnp.stack(offs, axis=0)                            # (4, B*Hp*Wp, 256)
    pooled = pallas_conv3_pool(p3, params['w3'], params['b3'])  # (B*Hp*Wp, 64)

    # Rows are already (b, hp, wp, c); wl1 was row-permuted at init to match
    # torch's NCHW flatten, so no runtime transpose is needed here.
    flat = pooled.reshape(b, hp * wp * 64)

    out = pallas_mlp_heads(flat, params['wl1'], params['bl1'],
                           params['wl2'], params['bl2'],
                           params['wh'], params['bh'])      # (B, 128) f32
    value = out[:, :1]
    advantage = out[:, 1:1 + n_actions]
    return value, advantage


# ---------------------------------------------------------------------------
# Parameter init (torch-layout, deterministic) and conversion to kernel layout
# ---------------------------------------------------------------------------
def init_torch_style_params(key, c, h, w, output_dim=256, n_actions=12):
    ks = jax.random.split(key, 14)

    def kaiming_conv(k, cout, cin, kh, kw):
        std = (2.0 / (cout * kh * kw)) ** 0.5          # fan_out, relu
        return jax.random.normal(k, (cout, cin, kh, kw), jnp.float32) * std

    def uni(k, shape, bound):
        return jax.random.uniform(k, shape, jnp.float32, -bound, bound)

    h1, w1 = (h - 4) // 4 + 1, (w - 4) // 4 + 1
    h2, w2 = (h1 - 2) // 2 + 1, (w1 - 2) // 2 + 1
    h3, w3 = h2 - 1, w2 - 1
    hp, wp = h3 // 2, w3 // 2
    flat = 64 * hp * wp

    p = {
        'conv1_w': kaiming_conv(ks[0], 32, c, 4, 4),
        'conv1_b': uni(ks[1], (32,), (c * 16) ** -0.5),
        'conv2_w': kaiming_conv(ks[2], 64, 32, 2, 2),
        'conv2_b': uni(ks[3], (64,), (32 * 4) ** -0.5),
        'conv3_w': kaiming_conv(ks[4], 64, 64, 2, 2),
        'conv3_b': uni(ks[5], (64,), (64 * 4) ** -0.5),
        'l1_w': uni(ks[6], (512, flat), flat ** -0.5),
        'l1_b': uni(ks[7], (512,), flat ** -0.5),
        'l2_w': uni(ks[8], (output_dim, 512), 512 ** -0.5),
        'l2_b': uni(ks[9], (output_dim,), 512 ** -0.5),
        # NoisyNet heads: forward() uses mu_weight / mu_bias only.
        'v_w': uni(ks[10], (1, output_dim), output_dim ** -0.5),
        'v_b': uni(ks[11], (1,), output_dim ** -0.5),
        'a_w': uni(ks[12], (n_actions, output_dim), output_dim ** -0.5),
        'a_b': uni(ks[13], (n_actions,), output_dim ** -0.5),
    }
    return p, (hp, wp)


def convert_params(tp, hp, wp, n_head_pad=128):
    def conv_w(w):
        cout, cin, kh, kw = w.shape
        return jnp.transpose(w, (2, 3, 1, 0)).reshape(
            kh * kw * cin, cout).astype(jnp.bfloat16)

    # Permute wl1 rows from torch's (C, Hp, Wp) flatten order to our
    # (Hp, Wp, C) order -> eliminates the runtime NHWC->NCHW transpose.
    l1 = tp['l1_w'].reshape(512, 64, hp, wp).transpose(2, 3, 1, 0)
    l1 = l1.reshape(hp * wp * 64, 512)

    # Fuse value + advantage heads into one GEMM; zero-pad N to 128 so the
    # output store is lane-dense.
    wh = jnp.concatenate([tp['v_w'].T, tp['a_w'].T], axis=1)      # (256, 13)
    wh = jnp.pad(wh, ((0, 0), (0, n_head_pad - wh.shape[1])))
    bh = jnp.concatenate([tp['v_b'], tp['a_b']])
    bh = jnp.pad(bh, (0, n_head_pad - bh.shape[0]))

    return {
        'w1': conv_w(tp['conv1_w']), 'b1': tp['conv1_b'],
        'w2': conv_w(tp['conv2_w']), 'b2': tp['conv2_b'],
        'w3': conv_w(tp['conv3_w']), 'b3': tp['conv3_b'],
        'wl1': l1.astype(jnp.bfloat16), 'bl1': tp['l1_b'],
        'wl2': tp['l2_w'].T.astype(jnp.bfloat16), 'bl2': tp['l2_b'],
        'wh': wh.astype(jnp.bfloat16), 'bh': bh,
    }


# ---------------------------------------------------------------------------
# Pure-jnp f32 reference (torch-layout params) for correctness check
# ---------------------------------------------------------------------------
def ref_forward(tp, x_nchw):
    hi = jax.lax.Precision.HIGHEST
    x = x_nchw.astype(jnp.float32)

    def conv(x, w, b, s):
        y = jax.lax.conv_general_dilated(
            x, w, window_strides=(s, s), padding='VALID',
            dimension_numbers=('NCHW', 'OIHW', 'NCHW'), precision=hi)
        return y + b.reshape(1, -1, 1, 1)

    y = jax.nn.relu(conv(x, tp['conv1_w'], tp['conv1_b'], 4))
    y = jax.nn.relu(conv(y, tp['conv2_w'], tp['conv2_b'], 2))
    y = conv(y, tp['conv3_w'], tp['conv3_b'], 1)              # no ReLU
    b, c, h, w = y.shape
    hp, wp = h // 2, w // 2
    y = y[:, :, :2 * hp, :2 * wp].reshape(b, c, hp, 2, wp, 2).max(axis=(3, 5))
    flat = y.reshape(b, -1)                                   # NCHW flatten
    h1 = jax.nn.relu(jnp.dot(flat, tp['l1_w'].T, precision=hi) + tp['l1_b'])
    h2 = jax.nn.relu(jnp.dot(h1, tp['l2_w'].T, precision=hi) + tp['l2_b'])
    value = jnp.dot(h2, tp['v_w'].T, precision=hi) + tp['v_b']
    advantage = jnp.dot(h2, tp['a_w'].T, precision=hi) + tp['a_b']
    return value, advantage


# ---------------------------------------------------------------------------
if __name__ == "__main__":
    # input_dim = (c, h, w) = (4, 32, 32): conv1 -> 8x8x32, conv2 -> 4x4x64,
    # conv3 -> 3x3x64, maxpool -> 1x1x64, flatten = 64.
    # (spatial must be >= 32 for the pool output to be non-empty.)
    B, C, H, W = 2, 4, 32, 32
    n_actions = 12

    key = jax.random.PRNGKey(0)
    k_params, k_x = jax.random.split(key)
    torch_params, (hp, wp) = init_torch_style_params(
        k_params, C, H, W, output_dim=256, n_actions=n_actions)
    params = convert_params(torch_params, hp, wp)
    x = jax.random.normal(k_x, (B, C, H, W), jnp.float32)

    fwd = jax.jit(ddqn_forward)
    value, advantage = fwd(params, x)
    value = jax.block_until_ready(value)
    advantage = jax.block_until_ready(advantage)

    assert value.shape == (B, 1)
    assert advantage.shape == (B, n_actions)

    # Cross-check against the plain-f32 reference (kernels use bf16 MXU inputs
    # with f32 accumulation, so allow a small tolerance).
    v_ref, a_ref = ref_forward(torch_params, x)
    assert jnp.allclose(value, v_ref, atol=3e-2, rtol=3e-2), \
        float(jnp.max(jnp.abs(value - v_ref)))
    assert jnp.allclose(advantage, a_ref, atol=3e-2, rtol=3e-2), \
        float(jnp.max(jnp.abs(advantage - a_ref)))

    print("KERNEL_OK")
</pallas_src>

<mosaic_0001>
module attributes {stable_mosaic.version = 11 : i64} {
  func.func @_gemm_bias_act_kernel(%arg0: i32, %arg1: memref<128x64xbf16, #tpu.memory_space<vmem>>, %arg2: memref<64x32xbf16, #tpu.memory_space<vmem>>, %arg3: memref<1x32xf32, #tpu.memory_space<vmem>>, %arg4: memref<128x32xbf16, #tpu.memory_space<vmem>>) attributes {dimension_semantics = [#tpu.dimension_semantics<parallel>], iteration_bounds = array<i64: 1>, scalar_prefetch = 0 : i64, scratch_operands = 0 : i64, tpu.core_type = #tpu.core_type<tc>, window_params = [{transform_indices = @transform_0, window_bounds = array<i64: 128, 64>}, {pipeline_mode = #tpu.pipeline_mode<synchronous>, transform_indices = @transform_1, window_bounds = array<i64: 64, 32>}, {pipeline_mode = #tpu.pipeline_mode<synchronous>, transform_indices = @transform_2, window_bounds = array<i64: 1, 32>}, {transform_indices = @transform_3, window_bounds = array<i64: 128, 32>}]} {
    %c0 = arith.constant 0 : index
    %c0_0 = arith.constant 0 : index
    %0 = vector.load %arg1[%c0, %c0_0] : memref<128x64xbf16, #tpu.memory_space<vmem>>, vector<128x64xbf16>
    %c0_1 = arith.constant 0 : index
    %c0_2 = arith.constant 0 : index
    %1 = vector.load %arg2[%c0_1, %c0_2] : memref<64x32xbf16, #tpu.memory_space<vmem>>, vector<64x32xbf16>
    %cst = arith.constant dense<0.000000e+00> : vector<128x32xf32>
    %2 = tpu.matmul %0, %1, %cst {dimension_numbers = #tpu.dot_dimension_numbers<[1], [0], [0], [1], [0, 0, 1, 1], [], []>} : vector<128x64xbf16>, vector<64x32xbf16>, vector<128x32xf32> -> vector<128x32xf32>
    %c0_3 = arith.constant 0 : index
    %c0_4 = arith.constant 0 : index
    %3 = vector.load %arg3[%c0_3, %c0_4] : memref<1x32xf32, #tpu.memory_space<vmem>>, vector<1x32xf32>
    %4 = vector.broadcast %3 : vector<1x32xf32> to vector<128x32xf32>
    %5 = arith.addf %2, %4 : vector<128x32xf32>
    %cst_5 = arith.constant 0.000000e+00 : f32
    %6 = vector.broadcast %cst_5 : f32 to vector<128x32xf32>
    %7 = arith.maximumf %5, %6 : vector<128x32xf32>
    %8 = arith.truncf %7 : vector<128x32xf32> to vector<128x32xbf16>
    %c0_6 = arith.constant 0 : index
    %c0_7 = arith.constant 0 : index
    %9 = vector.load %arg4[%c0_6, %c0_7] : memref<128x32xbf16, #tpu.memory_space<vmem>>, vector<128x32xbf16>
    tpu.vector_store %arg4[%c0_6, %c0_7], %8 {strides = array<i32>} : memref<128x32xbf16, #tpu.memory_space<vmem>>, vector<128x32xbf16>,
    return
  }
  func.func @transform_0(%arg0: i32) -> (i32, i32) {
    %c0_i32 = arith.constant 0 : i32
    %c0_i32_0 = arith.constant 0 : i32
    return %arg0, %c0_i32 : i32, i32
  }
  func.func @transform_1(%arg0: i32) -> (i32, i32) {
    %c0_i32 = arith.constant 0 : i32
    %c0_i32_0 = arith.constant 0 : i32
    %c0_i32_1 = arith.constant 0 : i32
    return %c0_i32, %c0_i32_0 : i32, i32
  }
  func.func @transform_2(%arg0: i32) -> (i32, i32) {
    %c0_i32 = arith.constant 0 : i32
    %c0_i32_0 = arith.constant 0 : i32
    %c0_i32_1 = arith.constant 0 : i32
    return %c0_i32, %c0_i32_0 : i32, i32
  }
  func.func @transform_3(%arg0: i32) -> (i32, i32) {
    %c0_i32 = arith.constant 0 : i32
    %c0_i32_0 = arith.constant 0 : i32
    return %arg0, %c0_i32 : i32, i32
  }
}

module attributes {stable_mosaic.version = 11 : i64} {
  func.func @_gemm_bias_act_kernel(%arg0: i32, %arg1: memref<32x128xbf16, #tpu.memory_space<vmem>>, %arg2: memref<128x64xbf16, #tpu.memory_space<vmem>>, %arg3: memref<1x64xf32, #tpu.memory_space<vmem>>, %arg4: memref<32x64xbf16, #tpu.memory_space<vmem>>) attributes {dimension_semantics = [#tpu.dimension_semantics<parallel>], iteration_bounds = array<i64: 1>, scalar_prefetch = 0 : i64, scratch_operands = 0 : i64, tpu.core_type = #tpu.core_type<tc>, window_params = [{transform_indices = @transform_0, window_bounds = array<i64: 32, 128>}, {pipeline_mode = #tpu.pipeline_mode<synchronous>, transform_indices = @transform_1, window_bounds = array<i64: 128, 64>}, {pipeline_mode = #tpu.pipeline_mode<synchronous>, transform_indices = @transform_2, window_bounds = array<i64: 1, 64>}, {transform_indices = @transform_3, window_bounds = array<i64: 32, 64>}]} {
    %c0 = arith.constant 0 : index
    %c0_0 = arith.constant 0 : index
    %0 = vector.load %arg1[%c0, %c0_0] : memref<32x128xbf16, #tpu.memory_space<vmem>>, vector<32x128xbf16>
    %c0_1 = arith.constant 0 : index
    %c0_2 = arith.constant 0 : index
    %1 = vector.load %arg2[%c0_1, %c0_2] : memref<128x64xbf16, #tpu.memory_space<vmem>>, vector<128x64xbf16>
    %cst = arith.constant dense<0.000000e+00> : vector<32x64xf32>
    %2 = tpu.matmul %0, %1, %cst {dimension_numbers = #tpu.dot_dimension_numbers<[1], [0], [0], [1], [0, 0, 1, 1], [], []>} : vector<32x128xbf16>, vector<128x64xbf16>, vector<32x64xf32> -> vector<32x64xf32>
    %c0_3 = arith.constant 0 : index
    %c0_4 = arith.constant 0 : index
    %3 = vector.load %arg3[%c0_3, %c0_4] : memref<1x64xf32, #tpu.memory_space<vmem>>, vector<1x64xf32>
    %4 = vector.broadcast %3 : vector<1x64xf32> to vector<32x64xf32>
    %5 = arith.addf %2, %4 : vector<32x64xf32>
    %cst_5 = arith.constant 0.000000e+00 : f32
    %6 = vector.broadcast %cst_5 : f32 to vector<32x64xf32>
    %7 = arith.maximumf %5, %6 : vector<32x64xf32>
    %8 = arith.truncf %7 : vector<32x64xf32> to vector<32x64xbf16>
    %c0_6 = arith.constant 0 : index
    %c0_7 = arith.constant 0 : index
    %9 = vector.load %arg4[%c0_6, %c0_7] : memref<32x64xbf16, #tpu.memory_space<vmem>>, vector<32x64xbf16>
    tpu.vector_store %arg4[%c0_6, %c0_7], %8 {strides = array<i32>} : memref<32x64xbf16, #tpu.memory_space<vmem>>, vector<32x64xbf16>,
    return
  }
  func.func @transform_0(%arg0: i32) -> (i32, i32) {
    %c0_i32 = arith.constant 0 : i32
    %c0_i32_0 = arith.constant 0 : i32
    return %arg0, %c0_i32 : i32, i32
  }
  func.func @transform_1(%arg0: i32) -> (i32, i32) {
    %c0_i32 = arith.constant 0 : i32
    %c0_i32_0 = arith.constant 0 : i32
    %c0_i32_1 = arith.constant 0 : i32
    return %c0_i32, %c0_i32_0 : i32, i32
  }
  func.func @transform_2(%arg0: i32) -> (i32, i32) {
    %c0_i32 = arith.constant 0 : i32
    %c0_i32_0 = arith.constant 0 : i32
    %c0_i32_1 = arith.constant 0 : i32
    return %c0_i32, %c0_i32_0 : i32, i32
  }
  func.func @transform_3(%arg0: i32) -> (i32, i32) {
    %c0_i32 = arith.constant 0 : i32
    %c0_i32_0 = arith.constant 0 : i32
    return %arg0, %c0_i32 : i32, i32
  }
}

module attributes {stable_mosaic.version = 11 : i64} {
  func.func @_conv3_pool_kernel(%arg0: i32, %arg1: memref<4x16x256xbf16, #tpu.memory_space<vmem>>, %arg2: memref<256x64xbf16, #tpu.memory_space<vmem>>, %arg3: memref<1x64xf32, #tpu.memory_space<vmem>>, %arg4: memref<16x64xbf16, #tpu.memory_space<vmem>>) attributes {dimension_semantics = [#tpu.dimension_semantics<parallel>], iteration_bounds = array<i64: 1>, scalar_prefetch = 0 : i64, scratch_operands = 0 : i64, tpu.core_type = #tpu.core_type<tc>, window_params = [{transform_indices = @transform_0, window_bounds = array<i64: 4, 16, 256>}, {pipeline_mode = #tpu.pipeline_mode<synchronous>, transform_indices = @transform_1, window_bounds = array<i64: 256, 64>}, {pipeline_mode = #tpu.pipeline_mode<synchronous>, transform_indices = @transform_2, window_bounds = array<i64: 1, 64>}, {transform_indices = @transform_3, window_bounds = array<i64: 16, 64>}]} {
    %c0 = arith.constant 0 : index
    %c0_0 = arith.constant 0 : index
    %0 = vector.load %arg2[%c0, %c0_0] : memref<256x64xbf16, #tpu.memory_space<vmem>>, vector<256x64xbf16>
    %c0_1 = arith.constant 0 : index
    %c0_2 = arith.constant 0 : index
    %c0_3 = arith.constant 0 : index
    %1 = vector.load %arg1[%c0_1, %c0_2, %c0_3] : memref<4x16x256xbf16, #tpu.memory_space<vmem>>, vector<1x16x256xbf16>
    %2 = vector.shape_cast %1 : vector<1x16x256xbf16> to vector<16x256xbf16>
    %cst = arith.constant dense<0.000000e+00> : vector<16x64xf32>
    %3 = tpu.matmul %2, %0, %cst {dimension_numbers = #tpu.dot_dimension_numbers<[1], [0], [0], [1], [0, 0, 1, 1], [], []>} : vector<16x256xbf16>, vector<256x64xbf16>, vector<16x64xf32> -> vector<16x64xf32>
    %c1 = arith.constant 1 : index
    %c0_4 = arith.constant 0 : index
    %c0_5 = arith.constant 0 : index
    %4 = vector.load %arg1[%c1, %c0_4, %c0_5] : memref<4x16x256xbf16, #tpu.memory_space<vmem>>, vector<1x16x256xbf16>
    %5 = vector.shape_cast %4 : vector<1x16x256xbf16> to vector<16x256xbf16>
    %cst_6 = arith.constant dense<0.000000e+00> : vector<16x64xf32>
    %6 = tpu.matmul %5, %0, %cst_6 {dimension_numbers = #tpu.dot_dimension_numbers<[1], [0], [0], [1], [0, 0, 1, 1], [], []>} : vector<16x256xbf16>, vector<256x64xbf16>, vector<16x64xf32> -> vector<16x64xf32>
    %7 = arith.maximumf %3, %6 : vector<16x64xf32>
    %c2 = arith.constant 2 : index
    %c0_7 = arith.constant 0 : index
    %c0_8 = arith.constant 0 : index
    %8 = vector.load %arg1[%c2, %c0_7, %c0_8] : memref<4x16x256xbf16, #tpu.memory_space<vmem>>, vector<1x16x256xbf16>
    %9 = vector.shape_cast %8 : vector<1x16x256xbf16> to vector<16x256xbf16>
    %cst_9 = arith.constant dense<0.000000e+00> : vector<16x64xf32>
    %10 = tpu.matmul %9, %0, %cst_9 {dimension_numbers = #tpu.dot_dimension_numbers<[1], [0], [0], [1], [0, 0, 1, 1], [], []>} : vector<16x256xbf16>, vector<256x64xbf16>, vector<16x64xf32> -> vector<16x64xf32>
    %11 = arith.maximumf %7, %10 : vector<16x64xf32>
    %c3 = arith.constant 3 : index
    %c0_10 = arith.constant 0 : index
    %c0_11 = arith.constant 0 : index
    %12 = vector.load %arg1[%c3, %c0_10, %c0_11] : memref<4x16x256xbf16, #tpu.memory_space<vmem>>, vector<1x16x256xbf16>
    %13 = vector.shape_cast %12 : vector<1x16x256xbf16> to vector<16x256xbf16>
    %cst_12 = arith.constant dense<0.000000e+00> : vector<16x64xf32>
    %14 = tpu.matmul %13, %0, %cst_12 {dimension_numbers = #tpu.dot_dimension_numbers<[1], [0], [0], [1], [0, 0, 1, 1], [], []>} : vector<16x256xbf16>, vector<256x64xbf16>, vector<16x64xf32> -> vector<16x64xf32>
    %15 = arith.maximumf %11, %14 : vector<16x64xf32>
    %c0_13 = arith.constant 0 : index
    %c0_14 = arith.constant 0 : index
    %16 = vector.load %arg3[%c0_13, %c0_14] : memref<1x64xf32, #tpu.memory_space<vmem>>, vector<1x64xf32>
    %17 = vector.broadcast %16 : vector<1x64xf32> to vector<16x64xf32>
    %18 = arith.addf %15, %17 : vector<16x64xf32>
    %19 = arith.truncf %18 : vector<16x64xf32> to vector<16x64xbf16>
    %c0_15 = arith.constant 0 : index
    %c0_16 = arith.constant 0 : index
    %20 = vector.load %arg4[%c0_15, %c0_16] : memref<16x64xbf16, #tpu.memory_space<vmem>>, vector<16x64xbf16>
    tpu.vector_store %arg4[%c0_15, %c0_16], %19 {strides = array<i32>} : memref<16x64xbf16, #tpu.memory_space<vmem>>, vector<16x64xbf16>,
    return
  }
  func.func @transform_0(%arg0: i32) -> (i32, i32, i32) {
    %c0_i32 = arith.constant 0 : i32
    %c0_i32_0 = arith.constant 0 : i32
    %c0_i32_1 = arith.constant 0 : i32
    return %c0_i32, %arg0, %c0_i32_0 : i32, i32, i32
  }
  func.func @transform_1(%arg0: i32) -> (i32, i32) {
    %c0_i32 = arith.constant 0 : i32
    %c0_i32_0 = arith.constant 0 : i32
    %c0_i32_1 = arith.constant 0 : i32
    return %c0_i32, %c0_i32_0 : i32, i32
  }
  func.func @transform_2(%arg0: i32) -> (i32, i32) {
    %c0_i32 = arith.constant 0 : i32
    %c0_i32_0 = arith.constant 0 : i32
    %c0_i32_1 = arith.constant 0 : i32
    return %c0_i32, %c0_i32_0 : i32, i32
  }
  func.func @transform_3(%arg0: i32) -> (i32, i32) {
    %c0_i32 = arith.constant 0 : i32
    %c0_i32_0 = arith.constant 0 : i32
    return %arg0, %c0_i32 : i32, i32
  }
}

module attributes {stable_mosaic.version = 11 : i64} {
  func.func @_mlp_heads_kernel(%arg0: i32, %arg1: memref<16x64xbf16, #tpu.memory_space<vmem>>, %arg2: memref<64x512xbf16, #tpu.memory_space<vmem>>, %arg3: memref<1x512xf32, #tpu.memory_space<vmem>>, %arg4: memref<512x256xbf16, #tpu.memory_space<vmem>>, %arg5: memref<1x256xf32, #tpu.memory_space<vmem>>, %arg6: memref<256x128xbf16, #tpu.memory_space<vmem>>, %arg7: memref<1x128xf32, #tpu.memory_space<vmem>>, %arg8: memref<16x128xf32, #tpu.memory_space<vmem>>) attributes {dimension_semantics = [#tpu.dimension_semantics<parallel>], iteration_bounds = array<i64: 1>, scalar_prefetch = 0 : i64, scratch_operands = 0 : i64, tpu.core_type = #tpu.core_type<tc>, window_params = [{transform_indices = @transform_0, window_bounds = array<i64: 16, 64>}, {pipeline_mode = #tpu.pipeline_mode<synchronous>, transform_indices = @transform_1, window_bounds = array<i64: 64, 512>}, {pipeline_mode = #tpu.pipeline_mode<synchronous>, transform_indices = @transform_2, window_bounds = array<i64: 1, 512>}, {pipeline_mode = #tpu.pipeline_mode<synchronous>, transform_indices = @transform_3, window_bounds = array<i64: 512, 256>}, {pipeline_mode = #tpu.pipeline_mode<synchronous>, transform_indices = @transform_4, window_bounds = array<i64: 1, 256>}, {pipeline_mode = #tpu.pipeline_mode<synchronous>, transform_indices = @transform_5, window_bounds = array<i64: 256, 128>}, {pipeline_mode = #tpu.pipeline_mode<synchronous>, transform_indices = @transform_6, window_bounds = array<i64: 1, 128>}, {transform_indices = @transform_7, window_bounds = array<i64: 16, 128>}]} {
    %c0 = arith.constant 0 : index
    %c0_0 = arith.constant 0 : index
    %0 = vector.load %arg1[%c0, %c0_0] : memref<16x64xbf16, #tpu.memory_space<vmem>>, vector<16x64xbf16>
    %c0_1 = arith.constant 0 : index
    %c0_2 = arith.constant 0 : index
    %1 = vector.load %arg2[%c0_1, %c0_2] : memref<64x512xbf16, #tpu.memory_space<vmem>>, vector<64x512xbf16>
    %cst = arith.constant dense<0.000000e+00> : vector<16x512xf32>
    %2 = tpu.matmul %0, %1, %cst {dimension_numbers = #tpu.dot_dimension_numbers<[1], [0], [0], [1], [0, 0, 1, 1], [], []>} : vector<16x64xbf16>, vector<64x512xbf16>, vector<16x512xf32> -> vector<16x512xf32>
    %c0_3 = arith.constant 0 : index
    %c0_4 = arith.constant 0 : index
    %3 = vector.load %arg3[%c0_3, %c0_4] : memref<1x512xf32, #tpu.memory_space<vmem>>, vector<1x512xf32>
    %4 = vector.broadcast %3 : vector<1x512xf32> to vector<16x512xf32>
    %5 = arith.addf %2, %4 : vector<16x512xf32>
    %cst_5 = arith.constant 0.000000e+00 : f32
    %6 = vector.broadcast %cst_5 : f32 to vector<16x512xf32>
    %7 = arith.maximumf %5, %6 : vector<16x512xf32>
    %8 = arith.truncf %7 : vector<16x512xf32> to vector<16x512xbf16>
    %c0_6 = arith.constant 0 : index
    %c0_7 = arith.constant 0 : index
    %9 = vector.load %arg4[%c0_6, %c0_7] : memref<512x256xbf16, #tpu.memory_space<vmem>>, vector<512x256xbf16>
    %cst_8 = arith.constant dense<0.000000e+00> : vector<16x256xf32>
    %10 = tpu.matmul %8, %9, %cst_8 {dimension_numbers = #tpu.dot_dimension_numbers<[1], [0], [0], [1], [0, 0, 1, 1], [], []>} : vector<16x512xbf16>, vector<512x256xbf16>, vector<16x256xf32> -> vector<16x256xf32>
    %c0_9 = arith.constant 0 : index
    %c0_10 = arith.constant 0 : index
    %11 = vector.load %arg5[%c0_9, %c0_10] : memref<1x256xf32, #tpu.memory_space<vmem>>, vector<1x256xf32>
    %12 = vector.broadcast %11 : vector<1x256xf32> to vector<16x256xf32>
    %13 = arith.addf %10, %12 : vector<16x256xf32>
    %cst_11 = arith.constant 0.000000e+00 : f32
    %14 = vector.broadcast %cst_11 : f32 to vector<16x256xf32>
    %15 = arith.maximumf %13, %14 : vector<16x256xf32>
    %16 = arith.truncf %15 : vector<16x256xf32> to vector<16x256xbf16>
    %c0_12 = arith.constant 0 : index
    %c0_13 = arith.constant 0 : index
    %17 = vector.load %arg6[%c0_12, %c0_13] : memref<256x128xbf16, #tpu.memory_space<vmem>>, vector<256x128xbf16>
    %cst_14 = arith.constant dense<0.000000e+00> : vector<16x128xf32>
    %18 = tpu.matmul %16, %17, %cst_14 {dimension_numbers = #tpu.dot_dimension_numbers<[1], [0], [0], [1], [0, 0, 1, 1], [], []>} : vector<16x256xbf16>, vector<256x128xbf16>, vector<16x128xf32> -> vector<16x128xf32>
    %c0_15 = arith.constant 0 : index
    %c0_16 = arith.constant 0 : index
    %19 = vector.load %arg7[%c0_15, %c0_16] : memref<1x128xf32, #tpu.memory_space<vmem>>, vector<1x128xf32>
    %20 = vector.broadcast %19 : vector<1x128xf32> to vector<16x128xf32>
    %21 = arith.addf %18, %20 : vector<16x128xf32>
    %c0_17 = arith.constant 0 : index
    %c0_18 = arith.constant 0 : index
    %22 = vector.load %arg8[%c0_17, %c0_18] : memref<16x128xf32, #tpu.memory_space<vmem>>, vector<16x128xf32>
    tpu.vector_store %arg8[%c0_17, %c0_18], %21 {strides = array<i32>} : memref<16x128xf32, #tpu.memory_space<vmem>>, vector<16x128xf32>,
    return
  }
  func.func @transform_0(%arg0: i32) -> (i32, i32) {
    %c0_i32 = arith.constant 0 : i32
    %c0_i32_0 = arith.constant 0 : i32
    return %arg0, %c0_i32 : i32, i32
  }
  func.func @transform_1(%arg0: i32) -> (i32, i32) {
    %c0_i32 = arith.constant 0 : i32
    %c0_i32_0 = arith.constant 0 : i32
    %c0_i32_1 = arith.constant 0 : i32
    return %c0_i32, %c0_i32_0 : i32, i32
  }
  func.func @transform_2(%arg0: i32) -> (i32, i32) {
    %c0_i32 = arith.constant 0 : i32
    %c0_i32_0 = arith.constant 0 : i32
    %c0_i32_1 = arith.constant 0 : i32
    return %c0_i32, %c0_i32_0 : i32, i32
  }
  func.func @transform_3(%arg0: i32) -> (i32, i32) {
    %c0_i32 = arith.constant 0 : i32
    %c0_i32_0 = arith.constant 0 : i32
    %c0_i32_1 = arith.constant 0 : i32
    return %c0_i32, %c0_i32_0 : i32, i32
  }
  func.func @transform_4(%arg0: i32) -> (i32, i32) {
    %c0_i32 = arith.constant 0 : i32
    %c0_i32_0 = arith.constant 0 : i32
    %c0_i32_1 = arith.constant 0 : i32
    return %c0_i32, %c0_i32_0 : i32, i32
  }
  func.func @transform_5(%arg0: i32) -> (i32, i32) {
    %c0_i32 = arith.constant 0 : i32
    %c0_i32_0 = arith.constant 0 : i32
    %c0_i32_1 = arith.constant 0 : i32
    return %c0_i32, %c0_i32_0 : i32, i32
  }
  func.func @transform_6(%arg0: i32) -> (i32, i32) {
    %c0_i32 = arith.constant 0 : i32
    %c0_i32_0 = arith.constant 0 : i32
    %c0_i32_1 = arith.constant 0 : i32
    return %c0_i32, %c0_i32_0 : i32, i32
  }
  func.func @transform_7(%arg0: i32) -> (i32, i32) {
    %c0_i32 = arith.constant 0 : i32
    %c0_i32_0 = arith.constant 0 : i32
    return %arg0, %c0_i32 : i32, i32
  }
}

</mosaic_0001>

<bundles_post_ra>
// kernel: ddqn_forward.4
= control target key start
LH: loop header
LB: loop body
LE: loop exit
PB: predicated region body
PF: predicated region fallthrough
CT: control target
= control target key end

     0   :  { %vm110_vm0 = vcmask 523264   ;;  %vm312_vm1 = vcmask 257024   ;;  %s591_s1 = inlined_call_operand.vmem [shape: bf16[64,32], index: 1, kind: input, shape index: {}]   ;;  %s592_s0 = inlined_call_operand.vmem [shape: bf16[128,64], index: 0, kind: input, shape index: {}]   ;;  %s593_s2 = inlined_call_operand.vmem [shape: f32[1,32], index: 2, kind: input, shape index: {}]   ;;  %s594_s3 = inlined_call_operand.vmem [shape: bf16[128,32], index: 3, kind: output, shape index: {}]  }
   0x1   :  { %v430_v0 = vld [vmem:[%s591_s1 + $0x18] sm:$0xff]   ;;  %v431_v1 = vld [vmem:[%s591_s1 + $0x10] sm:$0xff]   ;;  %v432_v2 = vld [vmem:[%s591_s1 + $0x8] sm:$0xff]  }
   0x2   :  { %398 = vmatprep.subr.bf16.mxu0 %v430_v0  ;;  %422 = vmatprep.subr.bf16.mxu1 %v430_v0  ;;  %v434_v3 = vld [vmem:[%s592_s0] sm:$0xff]   ;;  %v436_v6 = vld [vmem:[%s592_s0 + $0x8] sm:$0xff]   ;;  %v438_v8 = vld [vmem:[%s592_s0 + $0x10] sm:$0xff]  }
   0x3   :  { %399 = vmatpush3.bf16.msra.mxu0 %v430_v0  ;;  %426 = vmatpush3.bf16.msra.mxu1 %v430_v0  ;;  %v435_v4 = vld [vmem:[%s592_s0 + $0x20] sm:$0xff]   ;;  %v437_v7 = vld [vmem:[%s592_s0 + $0x28] sm:$0xff]   ;;  %v439_v9 = vld [vmem:[%s592_s0 + $0x30] sm:$0xff]  }
   0x4   :  { %400 = vmatprep.subr.bf16.mxu0 %v431_v1  ;;  %423 = vmatprep.subr.bf16.mxu1 %v431_v1  ;;  %v433_v5 = vld [vmem:[%s591_s1] sm:$0xff]   ;;  %v440_v10 = vld [vmem:[%s592_s0 + $0x18] sm:$0xff]  }
   0x5   :  { %406 = vmatprep.mubr.msk.bf16.mxu0 %vm110_vm0, %v434_v3  ;;  %414 = vmatprep.mubr.msk.bf16.mxu1 %vm110_vm0, %v435_v4  ;;  %v441_v11 = vld [vmem:[%s592_s0 + $0x38] sm:$0xff]   ;;  %v509_v12 = vld [vmem:[%s593_s2] ss:$0 sm:$0xff] }
   0x7   :  { %401 = vmatpush3.bf16.msra.mxu0 %v431_v1  ;;  %427 = vmatpush3.bf16.msra.mxu1 %v431_v1 }
   0x8   :  { %402 = vmatprep.subr.bf16.mxu0 %v432_v2  ;;  %424 = vmatprep.subr.bf16.mxu1 %v432_v2 }
   0xb   :  { %403 = vmatpush3.bf16.msra.mxu0 %v432_v2  ;;  %428 = vmatpush3.bf16.msra.mxu1 %v432_v2 }
   0xc   :  { %404 = vmatprep.subr.bf16.mxu0 %v433_v5  ;;  %425 = vmatprep.subr.bf16.mxu1 %v433_v5 }
   0xf   :  { %405 = vmatpush3.bf16.msra.mxu0 %v433_v5  ;;  %429 = vmatpush3.bf16.msra.mxu1 %v433_v5 }
  0x12   :  { %407 = vmatmul.mubr.msk.bf16.vlgmr.msra.gmra.mxu0 %vm110_vm0, %v436_v6  ;;  %415 = vmatmul.mubr.msk.bf16.vlgmr.msra.gmra.mxu1 %vm110_vm0, %v437_v7 }
  0x13   :  { %410 = vmatprep.mubr.msk.bf16.mxu0 %vm110_vm0, %v438_v8  ;;  %418 = vmatprep.mubr.msk.bf16.mxu1 %vm110_vm0, %v439_v9 }
  0x1a   :  { %411 = vmatmul.mubr.msk.bf16.gmra.mxu0 %vm110_vm0, %v440_v10  ;;  %419 = vmatmul.mubr.msk.bf16.gmra.mxu1 %vm110_vm0, %v441_v11 }
  0xd2   :  { %v408_v13 = vpop.f32.mrf.mxu0  ;;  %v416_v14 = vpop.f32.mrf.mxu1 }
  0xd3   :  { %v178_v15 = vadd.f32 %v408_v13, %v509_v12  ;;  %v210_v16 = vadd.f32 %v416_v14, %v509_v12 }
  0xd4   :  { %v169_v17 = vpop.f32.mrf.mxu0  ;;  %v201_v18 = vpop.f32.mrf.mxu1 }
  0xd5   :  { %v234_v19 = vmax.f32 %v178_v15, 0.0  ;;  %v242_v20 = vmax.f32 %v210_v16, 0.0  ;;  %v170_v21 = vadd.f32 %v509_v12, %v169_v17  ;;  %v202_v22 = vadd.f32 %v509_v12, %v201_v18 }
  0xd6   :  { %v409_v23 = vpop.f32.mrf.mxu0  ;;  %v417_v24 = vpop.f32.mrf.mxu1 }
  0xd7   :  { %v372_v25 = vpack.c.bf16 %v234_v19, %v234_v19  ;;  %v380_v26 = vpack.c.bf16 %v242_v20, %v242_v20  ;;  %v232_v27 = vmax.f32 %v170_v21, 0.0  ;;  %v240_v28 = vmax.f32 %v202_v22, 0.0 }
  0xd8   :  { %v181_v29 = vadd.f32 %v409_v23, %v509_v12  ;;  %v213_v30 = vadd.f32 %v417_v24, %v509_v12  ;;  %v172_v31 = vpop.f32.mrf.mxu0  ;;  %v204_v32 = vpop.f32.mrf.mxu1 }
  0xd9   :  { %315 = vst.msk [vmem:[%s594_s3 + $0x8] sm:$0xf] %vm312_vm1, %v372_v25  ;;  %323 = vst.msk [vmem:[%s594_s3 + $0x28] sm:$0xf] %vm312_vm1, %v380_v26  ;;  %v370_v33 = vpack.c.bf16 %v232_v27, %v232_v27  ;;  %v378_v34 = vpack.c.bf16 %v240_v28, %v240_v28  ;;  %v173_v35 = vadd.f32 %v509_v12, %v172_v31 }
  0xda   :  { %v205_v36 = vadd.f32 %v509_v12, %v204_v32  ;;  %v235_v37 = vmax.f32 %v181_v29, 0.0  ;;  %v243_v38 = vmax.f32 %v213_v30, 0.0  ;;  %v412_v39 = vpop.f32.mrf.mxu0  ;;  %v420_v40 = vpop.f32.mrf.mxu1 }
  0xdb   :  { %313 = vst.msk [vmem:[%s594_s3] sm:$0xf] %vm312_vm1, %v370_v33  ;;  %321 = vst.msk [vmem:[%s594_s3 + $0x20] sm:$0xf] %vm312_vm1, %v378_v34  ;;  %v233_v41 = vmax.f32 %v173_v35, 0.0  ;;  %v194_v43 = vadd.f32 %v412_v39, %v509_v12  ;;  %v226_v44 = vadd.f32 %v420_v40, %v509_v12 }
  0xdc   :  { %v241_v42 = vmax.f32 %v205_v36, 0.0  ;;  %v373_v45 = vpack.c.bf16 %v235_v37, %v235_v37  ;;  %v381_v46 = vpack.c.bf16 %v243_v38, %v243_v38  ;;  %v185_v47 = vpop.f32.mrf.mxu0  ;;  %v217_v48 = vpop.f32.mrf.mxu1 }
  0xdd   :  { %v371_v49 = vpack.c.bf16 %v233_v41, %v233_v41  ;;  %v238_v51 = vmax.f32 %v194_v43, 0.0  ;;  %v246_v52 = vmax.f32 %v226_v44, 0.0  ;;  %v186_v53 = vadd.f32 %v509_v12, %v185_v47 }
  0xde   :  { %v379_v50 = vpack.c.bf16 %v241_v42, %v241_v42  ;;  %316 = vst.msk [vmem:[%s594_s3 + $0xc] sm:$0xf] %vm312_vm1, %v373_v45  ;;  %324 = vst.msk [vmem:[%s594_s3 + $0x2c] sm:$0xf] %vm312_vm1, %v381_v46  ;;  %v218_v54 = vadd.f32 %v509_v12, %v217_v48  ;;  %v413_v55 = vpop.f32.mrf.mxu0  ;;  %v421_v56 = vpop.f32.mrf.mxu1 }
  0xdf   :  { %314 = vst.msk [vmem:[%s594_s3 + $0x4] sm:$0xf] %vm312_vm1, %v371_v49  ;;  %v376_v57 = vpack.c.bf16 %v238_v51, %v238_v51  ;;  %v384_v58 = vpack.c.bf16 %v246_v52, %v246_v52  ;;  %v197_v59 = vadd.f32 %v413_v55, %v509_v12  ;;  %v229_v60 = vadd.f32 %v421_v56, %v509_v12 }
  0xe0   :  { %322 = vst.msk [vmem:[%s594_s3 + $0x24] sm:$0xf] %vm312_vm1, %v379_v50  ;;  %v236_v61 = vmax.f32 %v186_v53, 0.0  ;;  %v244_v62 = vmax.f32 %v218_v54, 0.0  ;;  %v188_v63 = vpop.f32.mrf.mxu0  ;;  %v220_v0 = vpop.f32.mrf.mxu1 }
  0xe1   :  { %319 = vst.msk [vmem:[%s594_s3 + $0x18] sm:$0xf] %vm312_vm1, %v376_v57  ;;  %327 = vst.msk [vmem:[%s594_s3 + $0x38] sm:$0xf] %vm312_vm1, %v384_v58  ;;  %v239_v1 = vmax.f32 %v197_v59, 0.0  ;;  %v247_v2 = vmax.f32 %v229_v60, 0.0  ;;  %v189_v3 = vadd.f32 %v509_v12, %v188_v63  ;;  %v221_v4 = vadd.f32 %v509_v12, %v220_v0 }
  0xe2   :  { %v374_v5 = vpack.c.bf16 %v236_v61, %v236_v61  ;;  %v382_v6 = vpack.c.bf16 %v244_v62, %v244_v62 }
  0xe3   :  { %v377_v7 = vpack.c.bf16 %v239_v1, %v239_v1  ;;  %v385_v8 = vpack.c.bf16 %v247_v2, %v247_v2  ;;  %v237_v9 = vmax.f32 %v189_v3, 0.0  ;;  %v245_v10 = vmax.f32 %v221_v4, 0.0 }
  0xe4   :  { %317 = vst.msk [vmem:[%s594_s3 + $0x10] sm:$0xf] %vm312_vm1, %v374_v5  ;;  %325 = vst.msk [vmem:[%s594_s3 + $0x30] sm:$0xf] %vm312_vm1, %v382_v6 }
  0xe5   :  { %320 = vst.msk [vmem:[%s594_s3 + $0x1c] sm:$0xf] %vm312_vm1, %v377_v7  ;;  %328 = vst.msk [vmem:[%s594_s3 + $0x3c] sm:$0xf] %vm312_vm1, %v385_v8  ;;  %v375_v11 = vpack.c.bf16 %v237_v9, %v237_v9  ;;  %v383_v12 = vpack.c.bf16 %v245_v10, %v245_v10 }
  0xe7   :  { %318 = vst.msk [vmem:[%s594_s3 + $0x14] sm:$0xf] %vm312_vm1, %v375_v11  ;;  %326 = vst.msk [vmem:[%s594_s3 + $0x34] sm:$0xf] %vm312_vm1, %v383_v12 }

// kernel: ddqn_forward.5
= control target key start
LH: loop header
LB: loop body
LE: loop exit
PB: predicated region body
PF: predicated region fallthrough
CT: control target
= control target key end

     0   :  { %vm171_vm0 = vcmask 519168   ;;  %s304_s1 = inlined_call_operand.vmem [shape: bf16[128,64], index: 1, kind: input, shape index: {}]   ;;  %s305_s0 = inlined_call_operand.vmem [shape: bf16[32,128], index: 0, kind: input, shape index: {}]   ;;  %s306_s2 = inlined_call_operand.vmem [shape: f32[1,64], index: 2, kind: input, shape index: {}]   ;;  %s307_s3 = inlined_call_operand.vmem [shape: bf16[32,64], index: 3, kind: output, shape index: {}]  }
   0x1   :  { %v229_v0 = vld [vmem:[%s304_s1 + $0x38] sm:$0xff]   ;;  %v230_v1 = vld [vmem:[%s304_s1 + $0x30] sm:$0xff]   ;;  %v231_v2 = vld [vmem:[%s304_s1 + $0x28] sm:$0xff]  }
   0x2   :  { %209 = vmatprep.subr.bf16.mxu0 %v229_v0  ;;  %v232_v3 = vld [vmem:[%s304_s1 + $0x20] sm:$0xff]   ;;  %v233_v5 = vld [vmem:[%s304_s1 + $0x18] sm:$0xff]   ;;  %v234_v6 = vld [vmem:[%s304_s1 + $0x10] sm:$0xff]  }
   0x3   :  { %210 = vmatpush3.bf16.msra.mxu0 %v229_v0  ;;  %v237_v4 = vld [vmem:[%s305_s0] sm:$0xff]   ;;  %v235_v7 = vld [vmem:[%s304_s1 + $0x8] sm:$0xff]  }
   0x4   :  { %211 = vmatprep.subr.bf16.mxu0 %v230_v1  ;;  %225 = vmatprep.mubr.bf16.mxu0 %v237_v4  ;;  %v236_v8 = vld [vmem:[%s304_s1] sm:$0xff]   ;;  %v238_v9 = vld [vmem:[%s305_s0 + $0x8] sm:$0xff]  }
   0x5   :  { %v180_v10 = vld [vmem:[%s306_s2] ss:$0 sm:$0xff] }
   0x7   :  { %212 = vmatpush3.bf16.msra.mxu0 %v230_v1 }
   0x8   :  { %213 = vmatprep.subr.bf16.mxu0 %v231_v2 }
   0xb   :  { %214 = vmatpush3.bf16.msra.mxu0 %v231_v2 }
   0xc   :  { %215 = vmatprep.subr.bf16.mxu0 %v232_v3 }
   0xf   :  { %216 = vmatpush3.bf16.msra.mxu0 %v232_v3 }
  0x10   :  { %217 = vmatprep.subr.bf16.mxu0 %v233_v5 }
  0x13   :  { %218 = vmatpush3.bf16.msra.mxu0 %v233_v5 }
  0x14   :  { %219 = vmatprep.subr.bf16.mxu0 %v234_v6 }
  0x17   :  { %220 = vmatpush3.bf16.msra.mxu0 %v234_v6 }
  0x18   :  { %221 = vmatprep.subr.bf16.mxu0 %v235_v7 }
  0x1b   :  { %222 = vmatpush3.bf16.msra.mxu0 %v235_v7 }
  0x1c   :  { %223 = vmatprep.subr.bf16.mxu0 %v236_v8 }
  0x1f   :  { %224 = vmatpush3.bf16.msra.mxu0 %v236_v8 }
  0x22   :  { %226 = vmatmul.mubr.bf16.vlgmr.msra.gmra.mxu0 %v238_v9 }
  0xe2   :  { %v227_v11 = vpop.f32.mrf.mxu0 }
  0xe3   :  { %v145_v12 = vadd.f32 %v227_v11, %v180_v10 }
  0xe4   :  { %v136_v13 = vpop.f32.mrf.mxu0 }
  0xe5   :  { %v153_v14 = vmax.f32 %v145_v12, 0.0  ;;  %v137_v15 = vadd.f32 %v180_v10, %v136_v13 }
  0xe6   :  { %v228_v16 = vpop.f32.mrf.mxu0 }
  0xe7   :  { %v197_v17 = vpack.c.bf16 %v153_v14, %v153_v14  ;;  %v151_v18 = vmax.f32 %v137_v15, 0.0  ;;  %v148_v19 = vadd.f32 %v228_v16, %v180_v10 }
  0xe8   :  { %v139_v20 = vpop.f32.mrf.mxu0 }
  0xe9   :  { %174 = vst.msk [vmem:[%s307_s3 + $0x8] sm:$0xf] %vm171_vm0, %v197_v17  ;;  %v195_v21 = vpack.c.bf16 %v151_v18, %v151_v18  ;;  %v154_v22 = vmax.f32 %v148_v19, 0.0  ;;  %v140_v23 = vadd.f32 %v180_v10, %v139_v20 }
  0xeb   :  { %172 = vst.msk [vmem:[%s307_s3] sm:$0xf] %vm171_vm0, %v195_v21  ;;  %v198_v24 = vpack.c.bf16 %v154_v22, %v154_v22  ;;  %v152_v25 = vmax.f32 %v140_v23, 0.0 }
  0xed   :  { %175 = vst.msk [vmem:[%s307_s3 + $0xc] sm:$0xf] %vm171_vm0, %v198_v24  ;;  %v196_v26 = vpack.c.bf16 %v152_v25, %v152_v25 }
  0xef   :  { %173 = vst.msk [vmem:[%s307_s3 + $0x4] sm:$0xf] %vm171_vm0, %v196_v26 }

// kernel: ddqn_forward.6
= control target key start
LH: loop header
LB: loop body
LE: loop exit
PB: predicated region body
PF: predicated region fallthrough
CT: control target
= control target key end

     0   :  { %vm381_vm0 = vcmask 519168   ;;  %s640_s1 = inlined_call_operand.vmem [shape: bf16[256,64], index: 1, kind: input, shape index: {}]   ;;  %s641_s0 = inlined_call_operand.vmem [shape: bf16[4,16,256], index: 0, kind: input, shape index: {}]   ;;  %s642_s2 = inlined_call_operand.vmem [shape: f32[1,64], index: 2, kind: input, shape index: {}]   ;;  %s643_s3 = inlined_call_operand.vmem [shape: bf16[16,64], index: 3, kind: output, shape index: {}]  }
   0x1   :  { %v511_v0 = vld [vmem:[%s640_s1 + $0x78] sm:$0xff]   ;;  %v513_v2 = vld [vmem:[%s640_s1 + $0x70] sm:$0xff]   ;;  %v515_v4 = vld [vmem:[%s640_s1 + $0x68] sm:$0xff]  }
   0x2   :  { %v512_v1 = vld [vmem:[%s640_s1 + $0x38] sm:$0xff]   ;;  %423 = vmatprep.subr.bf16.mxu0 %v511_v0  ;;  %445 = vmatprep.subr.bf16.mxu1 %v511_v0  ;;  %v514_v3 = vld [vmem:[%s640_s1 + $0x30] sm:$0xff]   ;;  %v516_v5 = vld [vmem:[%s640_s1 + $0x28] sm:$0xff]  }
   0x3   :  { %424 = vmatpush3.bf16.msra.mxu0 %v512_v1  ;;  %446 = vmatpush3.bf16.msra.mxu1 %v512_v1  ;;  %v517_v6 = vld [vmem:[%s640_s1 + $0x60] sm:$0xff]   ;;  %v519_v8 = vld [vmem:[%s640_s1 + $0x58] sm:$0xff]   ;;  %v521_v10 = vld [vmem:[%s640_s1 + $0x50] sm:$0xff]  }
   0x4   :  { %425 = vmatprep.subr.bf16.mxu0 %v513_v2  ;;  %447 = vmatprep.subr.bf16.mxu1 %v513_v2  ;;  %v518_v7 = vld [vmem:[%s640_s1 + $0x20] sm:$0xff]   ;;  %v520_v9 = vld [vmem:[%s640_s1 + $0x18] sm:$0xff]   ;;  %v522_v13 = vld [vmem:[%s640_s1 + $0x10] sm:$0xff]  }
   0x5   :  { %v529_v11 = vld [vmem:[%s641_s0 + $0x4] ss:$8 sps:$4 sm:$0xff]   ;;  %v532_v12 = vld [vmem:[%s641_s0 + $0x14] ss:$8 sps:$4 sm:$0xff]   ;;  %v527_v18 = vld [vmem:[%s641_s0] ss:$8 sps:$4 sm:$0xff]  }
   0x6   :  { %v523_v14 = vld [vmem:[%s640_s1 + $0x48] sm:$0xff]   ;;  %187 = vmatprep.mubr.bf16.mxu0 %v529_v11  ;;  %241 = vmatprep.mubr.bf16.mxu1 %v532_v12  ;;  %v525_v16 = vld [vmem:[%s640_s1 + $0x40] sm:$0xff]   ;;  %v530_v19 = vld [vmem:[%s641_s0 + $0x10] ss:$8 sps:$4 sm:$0xff]  }
   0x7   :  { %426 = vmatpush3.bf16.msra.mxu0 %v514_v3  ;;  %448 = vmatpush3.bf16.msra.mxu1 %v514_v3  ;;  %v524_v15 = vld [vmem:[%s640_s1 + $0x8] sm:$0xff]   ;;  %v526_v17 = vld [vmem:[%s640_s1] sm:$0xff]   ;;  %v538_v21 = vld [vmem:[%s641_s0 + $0x34] ss:$8 sps:$4 sm:$0xff]  }
   0x8   :  { %427 = vmatprep.subr.bf16.mxu0 %v515_v4  ;;  %449 = vmatprep.subr.bf16.mxu1 %v515_v4  ;;  %v535_v20 = vld [vmem:[%s641_s0 + $0x24] ss:$8 sps:$4 sm:$0xff]   ;;  %v533_v22 = vld [vmem:[%s641_s0 + $0x20] ss:$8 sps:$4 sm:$0xff]   ;;  %v536_v23 = vld [vmem:[%s641_s0 + $0x30] ss:$8 sps:$4 sm:$0xff]  }
   0x9   :  { %v418_v46 = vld [vmem:[%s642_s2] ss:$0 sm:$0xff] }
   0xb   :  { %428 = vmatpush3.bf16.msra.mxu0 %v516_v5  ;;  %450 = vmatpush3.bf16.msra.mxu1 %v516_v5 }
   0xc   :  { %429 = vmatprep.subr.bf16.mxu0 %v517_v6  ;;  %451 = vmatprep.subr.bf16.mxu1 %v517_v6 }
   0xf   :  { %430 = vmatpush3.bf16.msra.mxu0 %v518_v7  ;;  %452 = vmatpush3.bf16.msra.mxu1 %v518_v7 }
  0x10   :  { %431 = vmatprep.subr.bf16.mxu0 %v519_v8  ;;  %453 = vmatprep.subr.bf16.mxu1 %v519_v8 }
  0x13   :  { %432 = vmatpush3.bf16.msra.mxu0 %v520_v9  ;;  %454 = vmatpush3.bf16.msra.mxu1 %v520_v9 }
  0x14   :  { %433 = vmatprep.subr.bf16.mxu0 %v521_v10  ;;  %455 = vmatprep.subr.bf16.mxu1 %v521_v10 }
  0x17   :  { %434 = vmatpush3.bf16.msra.mxu0 %v522_v13  ;;  %456 = vmatpush3.bf16.msra.mxu1 %v522_v13 }
  0x18   :  { %435 = vmatprep.subr.bf16.mxu0 %v523_v14  ;;  %457 = vmatprep.subr.bf16.mxu1 %v523_v14 }
  0x1b   :  { %436 = vmatpush3.bf16.msra.mxu0 %v524_v15  ;;  %458 = vmatpush3.bf16.msra.mxu1 %v524_v15 }
  0x1c   :  { %437 = vmatprep.subr.bf16.mxu0 %v525_v16  ;;  %459 = vmatprep.subr.bf16.mxu1 %v525_v16 }
  0x1f   :  { %438 = vmatpush3.bf16.msra.mxu0 %v526_v17  ;;  %460 = vmatpush3.bf16.msra.mxu1 %v526_v17 }
  0x20   :  { %467 = vmatprep.subr.bf16.mxu0 %v511_v0  ;;  %489 = vmatprep.subr.bf16.mxu1 %v511_v0 }
  0x22   :  { %188 = vmatmul.mubr.bf16.vlgmr.msra.gmra.mxu0 %v527_v18  ;;  %242 = vmatmul.mubr.bf16.vlgmr.msra.gmra.mxu1 %v530_v19 }
  0x23   :  { %468 = vmatpush3.bf16.msra.mxu0 %v512_v1  ;;  %490 = vmatpush3.bf16.msra.mxu1 %v512_v1 }
  0x24   :  { %469 = vmatprep.subr.bf16.mxu0 %v513_v2  ;;  %491 = vmatprep.subr.bf16.mxu1 %v513_v2 }
  0x25   :  { %297 = vmatprep.mubr.bf16.mxu0 %v535_v20  ;;  %353 = vmatprep.mubr.bf16.mxu1 %v538_v21 }
  0x27   :  { %470 = vmatpush3.bf16.msra.mxu0 %v514_v3  ;;  %492 = vmatpush3.bf16.msra.mxu1 %v514_v3 }
  0x28   :  { %471 = vmatprep.subr.bf16.mxu0 %v515_v4  ;;  %493 = vmatprep.subr.bf16.mxu1 %v515_v4 }
  0x2b   :  { %472 = vmatpush3.bf16.msra.mxu0 %v516_v5  ;;  %494 = vmatpush3.bf16.msra.mxu1 %v516_v5 }
  0x2c   :  { %473 = vmatprep.subr.bf16.mxu0 %v517_v6  ;;  %495 = vmatprep.subr.bf16.mxu1 %v517_v6 }
  0x2f   :  { %474 = vmatpush3.bf16.msra.mxu0 %v518_v7  ;;  %496 = vmatpush3.bf16.msra.mxu1 %v518_v7 }
  0x30   :  { %475 = vmatprep.subr.bf16.mxu0 %v519_v8  ;;  %497 = vmatprep.subr.bf16.mxu1 %v519_v8 }
  0x33   :  { %476 = vmatpush3.bf16.msra.mxu0 %v520_v9  ;;  %498 = vmatpush3.bf16.msra.mxu1 %v520_v9 }
  0x34   :  { %477 = vmatprep.subr.bf16.mxu0 %v521_v10  ;;  %499 = vmatprep.subr.bf16.mxu1 %v521_v10 }
  0x37   :  { %478 = vmatpush3.bf16.msra.mxu0 %v522_v13  ;;  %500 = vmatpush3.bf16.msra.mxu1 %v522_v13 }
  0x38   :  { %479 = vmatprep.subr.bf16.mxu0 %v523_v14  ;;  %501 = vmatprep.subr.bf16.mxu1 %v523_v14 }
  0x3b   :  { %480 = vmatpush3.bf16.msra.mxu0 %v524_v15  ;;  %502 = vmatpush3.bf16.msra.mxu1 %v524_v15 }
  0x3c   :  { %481 = vmatprep.subr.bf16.mxu0 %v525_v16  ;;  %503 = vmatprep.subr.bf16.mxu1 %v525_v16 }
  0x3f   :  { %482 = vmatpush3.bf16.msra.mxu0 %v526_v17  ;;  %504 = vmatpush3.bf16.msra.mxu1 %v526_v17 }
  0x42   :  { %298 = vmatmul.mubr.bf16.vlgmr.msra.gmra.mxu0 %v533_v22  ;;  %354 = vmatmul.mubr.bf16.vlgmr.msra.gmra.mxu1 %v536_v23 }
  0xe2   :  { %v439_v24 = vpop.f32.mrf.mxu0  ;;  %v461_v25 = vpop.f32.mrf.mxu1 }
  0xe4   :  { %v440_v26 = vpop.f32.mrf.mxu0  ;;  %v462_v27 = vpop.f32.mrf.mxu1 }
  0xe5   :  { %v441_v32 = vadd.f32 %v440_v26, %v439_v24  ;;  %v463_v33 = vadd.f32 %v462_v27, %v461_v25 }
  0xe6   :  { %v442_v28 = vpop.f32.mrf.mxu0  ;;  %v464_v29 = vpop.f32.mrf.mxu1 }
  0xe7   :  { %v250_v38 = vmax.f32 %v441_v32, %v463_v33 }
  0xe8   :  { %v443_v30 = vpop.f32.mrf.mxu0  ;;  %v465_v31 = vpop.f32.mrf.mxu1 }
  0xe9   :  { %v444_v39 = vadd.f32 %v443_v30, %v442_v28  ;;  %v466_v40 = vadd.f32 %v465_v31, %v464_v29 }
  0xeb   :  { %v251_v49 = vmax.f32 %v444_v39, %v466_v40 }
 0x102   :  { %v483_v34 = vpop.f32.mrf.mxu0  ;;  %v505_v35 = vpop.f32.mrf.mxu1 }
 0x104   :  { %v484_v36 = vpop.f32.mrf.mxu0  ;;  %v506_v37 = vpop.f32.mrf.mxu1 }
 0x105   :  { %v485_v41 = vadd.f32 %v484_v36, %v483_v34  ;;  %v507_v45 = vadd.f32 %v506_v37, %v505_v35 }
 0x106   :  { %v486_v42 = vpop.f32.mrf.mxu0  ;;  %v508_v43 = vpop.f32.mrf.mxu1 }
 0x107   :  { %v306_v44 = vmax.f32 %v250_v38, %v485_v41 }
 0x108   :  { %v487_v47 = vpop.f32.mrf.mxu0  ;;  %v509_v48 = vpop.f32.mrf.mxu1 }
 0x109   :  { %v362_v50 = vmax.f32 %v306_v44, %v507_v45  ;;  %v488_v51 = vadd.f32 %v487_v47, %v486_v42  ;;  %v510_v54 = vadd.f32 %v509_v48, %v508_v43 }
 0x10b   :  { %v371_v52 = vadd.f32 %v418_v46, %v362_v50  ;;  %v307_v53 = vmax.f32 %v251_v49, %v488_v51 }
 0x10d   :  { %v421_v55 = vpack.c.bf16 %v371_v52, %v371_v52  ;;  %v363_v56 = vmax.f32 %v307_v53, %v510_v54 }
 0x10f   :  { %382 = vst.msk [vmem:[%s643_s3] sm:$0xf] %vm381_vm0, %v421_v55  ;;  %v372_v57 = vadd.f32 %v418_v46, %v363_v56 }
 0x111   :  { %v422_v58 = vpack.c.bf16 %v372_v57, %v372_v57 }
 0x113   :  { %383 = vst.msk [vmem:[%s643_s3 + $0x4] sm:$0xf] %vm381_vm0, %v422_v58 }

// kernel: ddqn_forward.7
= control target key start
LH: loop header
LB: loop body
LE: loop exit
PB: predicated region body
PF: predicated region fallthrough
CT: control target
= control target key end

     0   :  { %v1184_v1 = vmov 0   ;;  %vm152_vm0 = vcmask 523264   ;;  %s1547_s1 = inlined_call_operand.vmem [shape: bf16[64,512], index: 1, kind: input, shape index: {}]   ;;  %s1548_s0 = inlined_call_operand.vmem [shape: bf16[16,64], index: 0, kind: input, shape index: {}]   ;;  %s1549_s3 = inlined_call_operand.vmem [shape: bf16[512,256], index: 3, kind: input, shape index: {}]   ;;  %s1550_s5 = inlined_call_operand.vmem [shape: bf16[256,128], index: 5, kind: input, shape index: {}]   ;;  %s1551_s2 = inlined_call_operand.vmem [shape: f32[1,512], index: 2, kind: input, shape index: {}]   ;;  %s1552_s4 = inlined_call_operand.vmem [shape: f32[1,256], index: 4, kind: input, shape index: {}]   ;;  %s1553_s6 = inlined_call_operand.vmem [shape: f32[1,128], index: 6, kind: input, shape index: {}]   ;;  %s1554_s7 = inlined_call_operand.vmem [shape: f32[16,128], index: 7, kind: output, shape index: {}]  }
   0x1   :  { %v1047_v0 = vld [vmem:[%s1547_s1 + $0x64] ss:$16 sps:$4 sm:$0xff]   ;;  %188 = vmatprep.mubr.bf16.mxu1 %v1184_v1  ;;  %v1049_v2 = vld [vmem:[%s1547_s1 + $0x60] ss:$16 sps:$4 sm:$0xff]   ;;  %v1062_v9 = vld [vmem:[%s1547_s1 + $0x6c] ss:$16 sps:$4 sm:$0xff]  }
   0x2   :  { %164 = vmatprep.subr.bf16.mxu1 %v1047_v0  ;;  %v1050_v3 = vld [vmem:[%s1547_s1 + $0x44] ss:$16 sps:$4 sm:$0xff]   ;;  %v1052_v4 = vld [vmem:[%s1547_s1 + $0x40] ss:$16 sps:$4 sm:$0xff]   ;;  %v1060_v14 = vld [vmem:[%s1547_s1 + $0x68] ss:$16 sps:$4 sm:$0xff]  }
   0x3   :  { %165 = vmatpush1.bf16.msra.mxu1 %v1049_v2  ;;  %v1053_v5 = vld [vmem:[%s1547_s1 + $0x24] ss:$16 sps:$4 sm:$0xff]   ;;  %v1055_v6 = vld [vmem:[%s1547_s1 + $0x20] ss:$16 sps:$4 sm:$0xff]   ;;  %v1065_v15 = vld [vmem:[%s1547_s1 + $0x4c] ss:$16 sps:$4 sm:$0xff]  }
   0x4   :  { %166 = vmatprep.subr.bf16.mxu1 %v1050_v3  ;;  %v1056_v7 = vld [vmem:[%s1547_s1 + $0x4] ss:$16 sps:$4 sm:$0xff]   ;;  %v1058_v8 = vld [vmem:[%s1547_s1] ss:$16 sps:$4 sm:$0xff]   ;;  %v1063_v18 = vld [vmem:[%s1547_s1 + $0x48] ss:$16 sps:$4 sm:$0xff]  }
   0x5   :  { %v1072_v10 = vld [vmem:[%s1549_s3 + $0x74] ss:$8 sps:$4 sm:$0xff]   ;;  %v1074_v11 = vld [vmem:[%s1549_s3 + $0x70] ss:$8 sps:$4 sm:$0xff]   ;;  %v1075_v12 = vld [vmem:[%s1549_s3 + $0x64] ss:$8 sps:$4 sm:$0xff]  }
   0x6   :  { %v1059_v13 = vld [vmem:[%s1548_s0] sm:$0xff]   ;;  %650 = vmatprep.subr.bf16.mxu0 %v1072_v10  ;;  %v1078_v17 = vld [vmem:[%s1549_s3 + $0x54] ss:$8 sps:$4 sm:$0xff]   ;;  %v1080_v20 = vld [vmem:[%s1549_s3 + $0x50] ss:$8 sps:$4 sm:$0xff]  }
   0x7   :  { %167 = vmatpush1.bf16.msra.mxu1 %v1052_v4  ;;  %651 = vmatpush1.bf16.msra.mxu0 %v1074_v11  ;;  %v1077_v16 = vld [vmem:[%s1549_s3 + $0x60] ss:$8 sps:$4 sm:$0xff]   ;;  %v1068_v19 = vld [vmem:[%s1547_s1 + $0x2c] ss:$16 sps:$4 sm:$0xff]   ;;  %v1089_v28 = vld [vmem:[%s1549_s3 + $0x30] ss:$8 sps:$4 sm:$0xff]  }
   0x8   :  { %168 = vmatprep.subr.bf16.mxu1 %v1053_v5  ;;  %652 = vmatprep.subr.bf16.mxu0 %v1075_v12  ;;  %v1081_v21 = vld [vmem:[%s1549_s3 + $0x44] ss:$8 sps:$4 sm:$0xff]   ;;  %v1066_v22 = vld [vmem:[%s1547_s1 + $0x28] ss:$16 sps:$4 sm:$0xff]   ;;  %v1084_v25 = vld [vmem:[%s1549_s3 + $0x34] ss:$8 sps:$4 sm:$0xff]  }
   0x9   :  { %v1071_v23 = vld [vmem:[%s1547_s1 + $0xc] ss:$16 sps:$4 sm:$0xff]   ;;  %v1083_v24 = vld [vmem:[%s1549_s3 + $0x40] ss:$8 sps:$4 sm:$0xff]   ;;  %v1086_v30 = vld [vmem:[%s1549_s3 + $0x170] ss:$8 sps:$4 sm:$0xff]  }
   0xa   :  { %v1069_v26 = vld [vmem:[%s1547_s1 + $0x8] ss:$16 sps:$4 sm:$0xff]   ;;  %v1088_v27 = vld [vmem:[%s1549_s3 + $0x174] ss:$8 sps:$4 sm:$0xff]   ;;  %v1090_v29 = vld [vmem:[%s1549_s3 + $0x24] ss:$8 sps:$4 sm:$0xff]  }
   0xb   :  { %169 = vmatpush1.bf16.msra.mxu1 %v1055_v6  ;;  %653 = vmatpush1.bf16.msra.mxu0 %v1077_v16  ;;  %v1094_v31 = vld [vmem:[%s1549_s3 + $0x164] ss:$8 sps:$4 sm:$0xff]   ;;  %v1095_v32 = vld [vmem:[%s1549_s3 + $0x20] ss:$8 sps:$4 sm:$0xff]   ;;  %v1096_v33 = vld [vmem:[%s1549_s3 + $0x14] ss:$8 sps:$4 sm:$0xff]  }
   0xc   :  { %170 = vmatprep.subr.bf16.mxu1 %v1056_v7  ;;  %654 = vmatprep.subr.bf16.mxu0 %v1078_v17  ;;  %v1092_v34 = vld [vmem:[%s1549_s3 + $0x160] ss:$8 sps:$4 sm:$0xff]   ;;  %v1100_v35 = vld [vmem:[%s1549_s3 + $0x154] ss:$8 sps:$4 sm:$0xff]   ;;  %v1101_v36 = vld [vmem:[%s1549_s3 + $0x10] ss:$8 sps:$4 sm:$0xff]  }
   0xd   :  { %v1102_v37 = vld [vmem:[%s1549_s3 + $0x4] ss:$8 sps:$4 sm:$0xff]   ;;  %v1098_v38 = vld [vmem:[%s1549_s3 + $0x150] ss:$8 sps:$4 sm:$0xff]   ;;  %v1107_v40 = vld [vmem:[%s1549_s3] ss:$8 sps:$4 sm:$0xff]  }
   0xe   :  { %v1106_v39 = vld [vmem:[%s1549_s3 + $0x144] ss:$8 sps:$4 sm:$0xff]   ;;  %v1104_v41 = vld [vmem:[%s1549_s3 + $0x140] ss:$8 sps:$4 sm:$0xff]   ;;  %v1108_v42 = vld [vmem:[%s1549_s3 + $0xf4] ss:$8 sps:$4 sm:$0xff]  }
   0xf   :  { %171 = vmatpush1.bf16.msra.mxu1 %v1058_v8  ;;  %655 = vmatpush1.bf16.msra.mxu0 %v1080_v20  ;;  %v1112_v43 = vld [vmem:[%s1549_s3 + $0x134] ss:$8 sps:$4 sm:$0xff]   ;;  %v1113_v44 = vld [vmem:[%s1549_s3 + $0xf0] ss:$8 sps:$4 sm:$0xff]   ;;  %v1114_v45 = vld [vmem:[%s1549_s3 + $0xe4] ss:$8 sps:$4 sm:$0xff]  }
  0x10   :  { %207 = vmatprep.subr.bf16.mxu1 %v1062_v9  ;;  %656 = vmatprep.subr.bf16.mxu0 %v1081_v21  ;;  %v1110_v46 = vld [vmem:[%s1549_s3 + $0x130] ss:$8 sps:$4 sm:$0xff]   ;;  %v1118_v47 = vld [vmem:[%s1549_s3 + $0x124] ss:$8 sps:$4 sm:$0xff]   ;;  %v1119_v48 = vld [vmem:[%s1549_s3 + $0xe0] ss:$8 sps:$4 sm:$0xff]  }
  0x11   :  { %v1120_v49 = vld [vmem:[%s1549_s3 + $0xd4] ss:$8 sps:$4 sm:$0xff]   ;;  %v1116_v50 = vld [vmem:[%s1549_s3 + $0x120] ss:$8 sps:$4 sm:$0xff]   ;;  %v1125_v52 = vld [vmem:[%s1549_s3 + $0xd0] ss:$8 sps:$4 sm:$0xff]  }
  0x12   :  { %941 = vmatmul.mubr.msk.bf16.vlgmr.msra.gmra.mxu1 %vm152_vm0, %v1059_v13  ;;  %v1124_v51 = vld [vmem:[%s1549_s3 + $0x114] ss:$8 sps:$4 sm:$0xff]   ;;  %v1126_v53 = vld [vmem:[%s1549_s3 + $0xc4] ss:$8 sps:$4 sm:$0xff]   ;;  %v1122_v54 = vld [vmem:[%s1549_s3 + $0x110] ss:$8 sps:$4 sm:$0xff]  }
  0x13   :  { %208 = vmatpush1.bf16.msra.mxu1 %v1060_v14  ;;  %231 = vmatprep.mubr.bf16.mxu1 %v1184_v1  ;;  %v1130_v55 = vld [vmem:[%s1549_s3 + $0x104] ss:$8 sps:$4 sm:$0xff]   ;;  %v1131_v56 = vld [vmem:[%s1549_s3 + $0xc0] ss:$8 sps:$4 sm:$0xff]   ;;  %v1132_v57 = vld [vmem:[%s1549_s3 + $0xb4] ss:$8 sps:$4 sm:$0xff]  }
  0x14   :  { %209 = vmatprep.subr.bf16.mxu1 %v1065_v15  ;;  %657 = vmatpush1.bf16.msra.mxu0 %v1083_v24  ;;  %v1128_v58 = vld [vmem:[%s1549_s3 + $0x100] ss:$8 sps:$4 sm:$0xff]   ;;  %v1136_v59 = vld [vmem:[%s1549_s3 + $0x1f4] ss:$8 sps:$4 sm:$0xff]   ;;  %v1137_v60 = vld [vmem:[%s1549_s3 + $0xb0] ss:$8 sps:$4 sm:$0xff]  }
  0x15   :  { %658 = vmatprep.subr.bf16.mxu0 %v1084_v25  ;;  %v1134_v61 = vld [vmem:[%s1549_s3 + $0x1f0] ss:$8 sps:$4 sm:$0xff]   ;;  %v1138_v62 = vld [vmem:[%s1549_s3 + $0xa4] ss:$8 sps:$4 sm:$0xff]   ;;  %v1140_v0 = vld [vmem:[%s1549_s3 + $0x1e0] ss:$8 sps:$4 sm:$0xff]  }
  0x16   :  { %v1142_v63 = vld [vmem:[%s1549_s3 + $0x1e4] ss:$8 sps:$4 sm:$0xff]   ;;  %v1143_v1 = vld [vmem:[%s1549_s3 + $0xa0] ss:$8 sps:$4 sm:$0xff]   ;;  %v1144_v2 = vld [vmem:[%s1549_s3 + $0x94] ss:$8 sps:$4 sm:$0xff]  }
  0x17   :  { %210 = vmatpush1.bf16.msra.mxu1 %v1063_v18  ;;  %v1148_v3 = vld [vmem:[%s1549_s3 + $0x1d4] ss:$8 sps:$4 sm:$0xff]   ;;  %v1146_v4 = vld [vmem:[%s1549_s3 + $0x1d0] ss:$8 sps:$4 sm:$0xff]   ;;  %v1150_v6 = vld [vmem:[%s1549_s3 + $0x84] ss:$8 sps:$4 sm:$0xff]  }
  0x18   :  { %211 = vmatprep.subr.bf16.mxu1 %v1068_v19  ;;  %659 = vmatpush1.bf16.msra.mxu0 %v1089_v28  ;;  %v1149_v5 = vld [vmem:[%s1549_s3 + $0x90] ss:$8 sps:$4 sm:$0xff]   ;;  %v1154_v7 = vld [vmem:[%s1549_s3 + $0x1c4] ss:$8 sps:$4 sm:$0xff]   ;;  %v1152_v8 = vld [vmem:[%s1549_s3 + $0x1c0] ss:$8 sps:$4 sm:$0xff]   ;;  %v47_v19 = vlaneseq }
  0x19   :  { %660 = vmatprep.subr.bf16.mxu0 %v1090_v29  ;;  %v1155_v9 = vld [vmem:[%s1549_s3 + $0x80] ss:$8 sps:$4 sm:$0xff]   ;;  %v1158_v10 = vld [vmem:[%s1549_s3 + $0x1b4] ss:$8 sps:$4 sm:$0xff]   ;;  %v1156_v11 = vld [vmem:[%s1549_s3 + $0x1b0] ss:$8 sps:$4 sm:$0xff]  }
  0x1a   :  { %v1161_v12 = vld [vmem:[%s1549_s3 + $0x1a4] ss:$8 sps:$4 sm:$0xff]   ;;  %v1164_v14 = vld [vmem:[%s1549_s3 + $0x194] ss:$8 sps:$4 sm:$0xff]   ;;  %v1162_v15 = vld [vmem:[%s1549_s3 + $0x190] ss:$8 sps:$4 sm:$0xff]  }
  0x1b   :  { %212 = vmatpush1.bf16.msra.mxu1 %v1066_v22  ;;  %v1167_v16 = vld [vmem:[%s1549_s3 + $0x184] ss:$8 sps:$4 sm:$0xff]   ;;  %v1165_v17 = vld [vmem:[%s1549_s3 + $0x180] ss:$8 sps:$4 sm:$0xff]   ;;  %v1168_v18 = vld [vmem:[%s1550_s5 + $0x78] sm:$0xff]   ;;  %v1473_v20 = vshrl.u32 %v47_v19, 7 }
  0x1c   :  { %213 = vmatprep.subr.bf16.mxu1 %v1071_v23  ;;  %661 = vmatpush1.bf16.msra.mxu0 %v1095_v32  ;;  %v45_v22 = vld [vmem:[%s1551_s2] sm:$0xf] }
  0x1d   :  { %662 = vmatprep.subr.bf16.mxu0 %v1096_v33  ;;  %v53_v21 = vsub.s32 1, %v1473_v20  ;;  %v49_v23 = vsub.s32 0, %v1473_v20 }
  0x1f   :  { %214 = vmatpush1.bf16.msra.mxu1 %v1069_v26  ;;  %v54_v25 = vrot.slane %v45_v22, %v53_v21  ;;  %v50_v26 = vrot.slane %v45_v22, %v49_v23 }
  0x20   :  { %693 = vmatprep.subr.bf16.mxu1 %v1088_v27  ;;  %663 = vmatpush1.bf16.msra.mxu0 %v1101_v36 }
  0x21   :  { %664 = vmatprep.subr.bf16.mxu0 %v1102_v37 }
  0x22   :  { %942 = vmatmul.mubr.msk.bf16.vlgmr.msra.gmra.mxu1 %vm152_vm0, %v1059_v13  ;;  %v1159_v13 = vld [vmem:[%s1549_s3 + $0x1a0] ss:$8 sps:$4 sm:$0xff]  }
  0x23   :  { %694 = vmatpush1.bf16.msra.mxu1 %v1086_v30 }
  0x24   :  { %695 = vmatprep.subr.bf16.mxu1 %v1094_v31  ;;  %665 = vmatpush1.bf16.msra.mxu0 %v1107_v40 }
  0x25   :  { %666 = vmatprep.subr.bf16.mxu0 %v1108_v42  ;;  %v57_v42 = vsub.s32 2, %v1473_v20 }
  0x27   :  { %696 = vmatpush1.bf16.msra.mxu1 %v1092_v34 }
  0x28   :  { %697 = vmatprep.subr.bf16.mxu1 %v1100_v35  ;;  %667 = vmatpush2.bf16.msra.mxu0 %v1113_v44 }
  0x29   :  { %668 = vmatprep.subr.bf16.mxu0 %v1114_v45  ;;  %v58_v45 = vrot.slane %v45_v22, %v57_v42 }
  0x2b   :  { %698 = vmatpush1.bf16.msra.mxu1 %v1098_v38 }
  0x2c   :  { %699 = vmatprep.subr.bf16.mxu1 %v1106_v39  ;;  %669 = vmatpush2.bf16.msra.mxu0 %v1119_v48  ;;  %v1169_v39 = vld [vmem:[%s1550_s5 + $0x38] sm:$0xff]  }
  0x2d   :  { %670 = vmatprep.subr.bf16.mxu0 %v1120_v49 }
  0x2f   :  { %700 = vmatpush1.bf16.msra.mxu1 %v1104_v41  ;;  %v61_v41 = vsub.s32 3, %v1473_v20 }
  0x30   :  { %701 = vmatprep.subr.bf16.mxu1 %v1112_v43  ;;  %671 = vmatpush2.bf16.msra.mxu0 %v1125_v52 }
  0x31   :  { %672 = vmatprep.subr.bf16.mxu0 %v1126_v53  ;;  %v62_v44 = vrot.slane %v45_v22, %v61_v41 }
  0x33   :  { %702 = vmatpush1.bf16.msra.mxu1 %v1110_v46 }
  0x34   :  { %703 = vmatprep.subr.bf16.mxu1 %v1118_v47  ;;  %673 = vmatpush2.bf16.msra.mxu0 %v1131_v56 }
  0x35   :  { %674 = vmatprep.subr.bf16.mxu0 %v1132_v57 }
  0x37   :  { %704 = vmatpush1.bf16.msra.mxu1 %v1116_v50 }
  0x38   :  { %705 = vmatprep.subr.bf16.mxu1 %v1124_v51  ;;  %675 = vmatpush2.bf16.msra.mxu0 %v1137_v60  ;;  %v1171_v60 = vld [vmem:[%s1550_s5 + $0x30] sm:$0xff]  }
  0x39   :  { %676 = vmatprep.subr.bf16.mxu0 %v1138_v62  ;;  %v1173_v62 = vld [vmem:[%s1550_s5 + $0x28] sm:$0xff]  }
  0x3b   :  { %706 = vmatpush1.bf16.msra.mxu1 %v1122_v54 }
  0x3c   :  { %707 = vmatprep.subr.bf16.mxu1 %v1130_v55  ;;  %677 = vmatpush2.bf16.msra.mxu0 %v1143_v1  ;;  %v1176_v1 = vld [vmem:[%s1550_s5 + $0x58] sm:$0xff]  }
  0x3d   :  { %678 = vmatprep.subr.bf16.mxu0 %v1144_v2  ;;  %v1177_v2 = vld [vmem:[%s1550_s5 + $0x18] sm:$0xff]  }
  0x3f   :  { %708 = vmatpush1.bf16.msra.mxu1 %v1128_v58 }
  0x40   :  { %709 = vmatprep.subr.bf16.mxu1 %v1136_v59  ;;  %679 = vmatpush2.bf16.msra.mxu0 %v1149_v5  ;;  %v1170_v59 = vld [vmem:[%s1550_s5 + $0x70] sm:$0xff]   ;;  %v1180_v5 = vld [vmem:[%s1550_s5 + $0x48] sm:$0xff]  }
  0x41   :  { %680 = vmatprep.subr.bf16.mxu0 %v1150_v6  ;;  %v1181_v6 = vld [vmem:[%s1550_s5 + $0x8] sm:$0xff]  }
  0x43   :  { %710 = vmatpush2.bf16.msra.mxu1 %v1134_v61  ;;  %v1172_v61 = vld [vmem:[%s1550_s5 + $0x68] sm:$0xff]  }
  0x44   :  { %711 = vmatprep.subr.bf16.mxu1 %v1142_v63  ;;  %681 = vmatpush2.bf16.msra.mxu0 %v1155_v9  ;;  %v1174_v63 = vld [vmem:[%s1550_s5 + $0x60] sm:$0xff]  }
  0x45   :  { %1024 = vmatprep.subr.bf16.mxu0 %v1168_v18 }
  0x47   :  { %712 = vmatpush2.bf16.msra.mxu1 %v1140_v0  ;;  %v1175_v0 = vld [vmem:[%s1550_s5 + $0x20] sm:$0xff]  }
  0x48   :  { %713 = vmatprep.subr.bf16.mxu1 %v1148_v3  ;;  %v1178_v3 = vld [vmem:[%s1550_s5 + $0x50] sm:$0xff]  }
  0x4b   :  { %714 = vmatpush2.bf16.msra.mxu1 %v1146_v4  ;;  %v1179_v4 = vld [vmem:[%s1550_s5 + $0x10] sm:$0xff]  }
  0x4c   :  { %715 = vmatprep.subr.bf16.mxu1 %v1154_v7  ;;  %v1182_v7 = vld [vmem:[%s1550_s5 + $0x40] sm:$0xff]  }
  0x4f   :  { %716 = vmatpush2.bf16.msra.mxu1 %v1152_v8  ;;  %v1183_v8 = vld [vmem:[%s1550_s5] sm:$0xff]  }
  0x50   :  { %717 = vmatprep.subr.bf16.mxu1 %v1158_v10 }
  0x53   :  { %718 = vmatpush2.bf16.msra.mxu1 %v1156_v11  ;;  %v318_v11 = vld [vmem:[%s1552_s4] sm:$0x3] }
  0x54   :  { %719 = vmatprep.subr.bf16.mxu1 %v1161_v12 }
  0x57   :  { %720 = vmatpush2.bf16.msra.mxu1 %v1159_v13  ;;  %v327_v13 = vrot.slane %v318_v11, %v53_v21 }
  0x58   :  { %721 = vmatprep.subr.bf16.mxu1 %v1164_v14  ;;  %v323_v14 = vrot.slane %v318_v11, %v49_v23 }
  0x5b   :  { %722 = vmatpush2.bf16.msra.mxu1 %v1162_v15 }
  0x5c   :  { %723 = vmatprep.subr.bf16.mxu1 %v1167_v16 }
  0x5f   :  { %724 = vmatpush2.bf16.msra.mxu1 %v1165_v17 }
  0xd2   :  { %v190_v24 = vpop.f32.mrf.mxu1 }
  0xd3   :  { %v191_v31 = vadd.f32 %v190_v24, %v50_v26 }
  0xd4   :  { %v192_v27 = vpop.f32.mrf.mxu1 }
  0xd5   :  { %v193_v29 = vadd.f32 %v192_v27, %v54_v25  ;;  %v242_v37 = vmax.f32 %v191_v31, 0.0 }
  0xd6   :  { %v194_v28 = vpop.f32.mrf.mxu1 }
  0xd7   :  { %v195_v30 = vadd.f32 %v194_v28, %v50_v26  ;;  %v243_v35 = vmax.f32 %v193_v29, 0.0 }
  0xd8   :  { %v196_v32 = vpop.f32.mrf.mxu1 }
  0xd9   :  { %v197_v33 = vadd.f32 %v196_v32, %v54_v25  ;;  %v246_v34 = vmax.f32 %v195_v30, 0.0 }
  0xdb   :  { %v247_v36 = vmax.f32 %v197_v33, 0.0  ;;  %v250_v40 = vpack.c.bf16 %v246_v34, %v242_v37 }
  0xdd   :  { %v251_v38 = vpack.c.bf16 %v247_v36, %v243_v35  ;;  %v1007_v35 = vld [vmem:[%s1553_s6] ss:$0 sm:$0xff] }
  0xdf   :  { %682 = vmatprep.mubr.bf16.mxu0 %v251_v38 }
  0xe0   :  { %683 = vmatmul.mubr.bf16.vlgmr.msra.gmra.mxu0 %v250_v40 }
  0xe1   :  { %1025 = vmatpush3.bf16.msra.mxu0 %v1169_v39 }
  0xe2   :  { %v233_v43 = vpop.f32.mrf.mxu1  ;;  %1026 = vmatprep.subr.bf16.mxu0 %v1170_v59 }
  0xe3   :  { %v234_v50 = vadd.f32 %v233_v43, %v58_v45 }
  0xe4   :  { %v235_v46 = vpop.f32.mrf.mxu1 }
  0xe5   :  { %v236_v48 = vadd.f32 %v235_v46, %v62_v44  ;;  %v244_v56 = vmax.f32 %v234_v50, 0.0  ;;  %1027 = vmatpush3.bf16.msra.mxu0 %v1171_v60 }
  0xe6   :  { %v237_v47 = vpop.f32.mrf.mxu1  ;;  %1028 = vmatprep.subr.bf16.mxu0 %v1172_v61 }
  0xe7   :  { %v238_v49 = vadd.f32 %v237_v47, %v58_v45  ;;  %v245_v54 = vmax.f32 %v236_v48, 0.0 }
  0xe8   :  { %v239_v51 = vpop.f32.mrf.mxu1 }
  0xe9   :  { %v240_v52 = vadd.f32 %v239_v51, %v62_v44  ;;  %v248_v53 = vmax.f32 %v238_v49, 0.0  ;;  %1029 = vmatpush3.bf16.msra.mxu0 %v1173_v62 }
  0xea   :  { %1030 = vmatprep.subr.bf16.mxu0 %v1174_v63 }
  0xeb   :  { %v249_v55 = vmax.f32 %v240_v52, 0.0  ;;  %v252_v58 = vpack.c.bf16 %v248_v53, %v244_v56 }
  0xed   :  { %v253_v57 = vpack.c.bf16 %v249_v55, %v245_v54  ;;  %1031 = vmatpush3.bf16.msra.mxu0 %v1175_v0 }
  0xee   :  { %1032 = vmatprep.subr.bf16.mxu0 %v1176_v1 }
  0xef   :  { %725 = vmatprep.mubr.bf16.mxu1 %v253_v57 }
  0xf0   :  { %726 = vmatmul.mubr.bf16.vlgmr.msra.gmra.mxu1 %v252_v58 }
  0xf1   :  { %1033 = vmatpush3.bf16.msra.mxu0 %v1177_v2 }
  0xf2   :  { %1034 = vmatprep.subr.bf16.mxu0 %v1178_v3 }
  0xf5   :  { %1035 = vmatpush3.bf16.msra.mxu0 %v1179_v4 }
  0xf6   :  { %1036 = vmatprep.subr.bf16.mxu0 %v1180_v5 }
  0xf9   :  { %1037 = vmatpush3.bf16.msra.mxu0 %v1181_v6 }
  0xfa   :  { %1038 = vmatprep.subr.bf16.mxu0 %v1182_v7 }
  0xfd   :  { %1039 = vmatpush3.bf16.msra.mxu0 %v1183_v8 }
 0x1a0   :  { %v684_v9 = vpop.f32.mrf.mxu0 }
 0x1a1   :  { %v685_v22 = vadd.f32 %v684_v9, %v323_v14 }
 0x1a2   :  { %v686_v10 = vpop.f32.mrf.mxu0 }
 0x1a3   :  { %v687_v18 = vadd.f32 %v686_v10, %v327_v13 }
 0x1a4   :  { %v688_v12 = vpop.f32.mrf.mxu0 }
 0x1a5   :  { %v689_v19 = vadd.f32 %v688_v12, %v323_v14 }
 0x1a6   :  { %v690_v16 = vpop.f32.mrf.mxu0 }
 0x1a7   :  { %v691_v25 = vadd.f32 %v690_v16, %v327_v13 }
 0x1b0   :  { %v727_v15 = vpop.f32.mrf.mxu1 }
 0x1b1   :  { %v728_v28 = vadd.f32 %v727_v15, %v685_v22 }
 0x1b2   :  { %v729_v17 = vpop.f32.mrf.mxu1 }
 0x1b3   :  { %v730_v26 = vadd.f32 %v729_v17, %v687_v18  ;;  %v736_v21 = vmax.f32 %v728_v28, 0.0 }
 0x1b4   :  { %v731_v24 = vpop.f32.mrf.mxu1 }
 0x1b5   :  { %v732_v27 = vadd.f32 %v731_v24, %v689_v19  ;;  %v737_v32 = vmax.f32 %v730_v26, 0.0 }
 0x1b6   :  { %v733_v29 = vpop.f32.mrf.mxu1 }
 0x1b7   :  { %v734_v30 = vadd.f32 %v733_v29, %v691_v25  ;;  %v738_v31 = vmax.f32 %v732_v27, 0.0 }
 0x1b9   :  { %v739_v33 = vmax.f32 %v734_v30, 0.0  ;;  %v740_v20 = vpack.c.bf16 %v738_v31, %v736_v21 }
 0x1bb   :  { %v741_v34 = vpack.c.bf16 %v739_v33, %v737_v32 }
 0x1bd   :  { %909 = vmatprep.mubr.bf16.mxu0 %v741_v34 }
 0x1be   :  { %910 = vmatmul.mubr.bf16.vlgmr.msra.gmra.mxu0 %v740_v20 }
 0x27e   :  { %v1040_v23 = vpop.f32.mrf.mxu0 }
 0x280   :  { %v1041_v36 = vpop.f32.mrf.mxu0 }
 0x281   :  { %v1042_v37 = vadd.f32 %v1041_v36, %v1040_v23 }
 0x282   :  { %v1043_v38 = vpop.f32.mrf.mxu0 }
 0x283   :  { %v912_v39 = vadd.f32 %v1042_v37, %v1007_v35 }
 0x284   :  { %v1044_v40 = vpop.f32.mrf.mxu0 }
 0x285   :  { %918 = vst [vmem:[%s1554_s7] sm:$0xff] %v912_v39  ;;  %v1045_v41 = vadd.f32 %v1044_v40, %v1043_v38 }
 0x287   :  { %v915_v42 = vadd.f32 %v1045_v41, %v1007_v35 }
 0x289   :  { %919 = vst [vmem:[%s1554_s7 + $0x8] sm:$0xff] %v915_v42 }

</bundles_post_ra>
